<compile_context>
chip_gen: v7x
topology: tpu7x:2x2x1
jax: 0.10.0
libtpu: 0.0.40
codegen_flags: <defaults>
</compile_context>

<pallas_src>
import functools
import math

import jax
import jax.numpy as jnp
from jax.experimental import pallas as pl
from jax.experimental.pallas import tpu as pltpu


# ----------------------------- fused layer kernel -----------------------------

def _make_decoder_layer_kernel(nhead, eps, has_pos, has_qpos, has_bias):
    """Builds the fused kernel body for one batch element per grid step."""

    def kernel(*refs):
        it = iter(refs)
        tgt_ref = next(it)
        mem_ref = next(it)
        pos_ref = next(it) if has_pos else None
        qpos_ref = next(it) if has_qpos else None
        bias_ref = next(it) if has_bias else None
        (sa_wqk_ref, sa_bqk_ref, sa_wv_ref, sa_bv_ref, sa_wo_ref, sa_bo_ref,
         ca_w_ref, ca_b_ref, w1_ref, b1_ref, w2_ref, b2_ref,
         ln_g_ref, ln_b_ref, out_ref, attn_ref) = it

        f32 = jnp.float32
        bf16 = jnp.bfloat16
        _, Q, C = tgt_ref.shape
        H = nhead
        Dh = C // H
        scale = 1.0 / math.sqrt(Dh)

        tgt = tgt_ref[0].astype(f32)                      # (Q, C)
        mem = mem_ref[0].astype(f32)                      # (HWp, C)
        qpos = qpos_ref[0].astype(f32) if has_qpos else None
        pos = pos_ref[0].astype(f32) if has_pos else None

        def layer_norm(x, idx):
            # Stats and elementwise math kept in f32 (v5e VPU/EUP have no bf16).
            g = ln_g_ref[idx:idx + 1, :]                  # (1, C) f32
            b = ln_b_ref[idx:idx + 1, :]
            mu = jnp.mean(x, axis=-1, keepdims=True)
            xc = x - mu
            var = jnp.mean(xc * xc, axis=-1, keepdims=True)
            return xc * jax.lax.rsqrt(var + eps) * g + b

        def split_heads(x):
            # (L, C) -> head-major (H, L, Dh): static lane slices + leading stack.
            return jnp.stack([x[:, h * Dh:(h + 1) * Dh] for h in range(H)], axis=0)

        def merge_heads(x3):
            # (H, L, Dh) -> (L, C)
            return jnp.concatenate([x3[h] for h in range(H)], axis=-1)

        def attend(q, k, v, bias, want_probs):
            # q: (Lq, C); k, v: (Lk, C); all f32.  One batched score matmul, one
            # stacked softmax, one batched P.V matmul: back-to-back MXU pushes.
            q3 = split_heads(q).astype(bf16)              # (H, Lq, Dh)
            k3 = split_heads(k).astype(bf16)              # (H, Lk, Dh)
            v3 = split_heads(v).astype(bf16)              # (H, Lk, Dh)
            s = jnp.einsum("hqd,hkd->hqk", q3, k3,
                           preferred_element_type=f32) * scale        # (H,Lq,Lk) f32
            if bias is not None:
                s = s + bias                              # mask bias applied in f32
            m = jnp.max(s, axis=-1, keepdims=True)
            e = jnp.exp(s - m)
            denom = jnp.sum(e, axis=-1, keepdims=True)
            recip = 1.0 / denom                           # exact (parity w/ torch)
            if want_probs:
                p = e * recip                             # needed for returned probs
                o3 = jnp.einsum("hqk,hkd->hqd", p.astype(bf16), v3,
                                preferred_element_type=f32)
                probs = p[0]
                for h in range(1, H):                     # head-average (static)
                    probs = probs + p[h]
                probs = probs * (1.0 / H)                 # (Lq, Lk)
            else:
                # Deferred normalization: scale the small (H,Lq,Dh) context
                # instead of the (H,Lq,Lk) probability matrix.
                o3 = jnp.einsum("hqk,hkd->hqd", e.astype(bf16), v3,
                                preferred_element_type=f32) * recip
                probs = None
            return merge_heads(o3), probs

        # ---- self-attention: q = k = tgt + query_pos, value = tgt ----
        qk_src = tgt + qpos if has_qpos else tgt
        qk = jnp.dot(qk_src.astype(bf16), sa_wqk_ref[...],
                     preferred_element_type=f32) + sa_bqk_ref[...]    # fused Q||K
        v_sa = jnp.dot(tgt.astype(bf16), sa_wv_ref[...],
                       preferred_element_type=f32) + sa_bv_ref[...]
        ctx, _ = attend(qk[:, :C], qk[:, C:], v_sa, None, want_probs=False)
        sa_out = jnp.dot(ctx.astype(bf16), sa_wo_ref[...],
                         preferred_element_type=f32) + sa_bo_ref[...]
        x = layer_norm(tgt + sa_out, 0)

        # ---- cross-attention over (padded) encoder memory ----
        # TODO(synk): for very large HW on v7x (64 MiB VMEM) tile this over HW
        # blocks with an online-softmax accumulator instead of one slab.
        q_src = x + qpos if has_qpos else x
        k_src = mem + pos if has_pos else mem
        q_ca = jnp.dot(q_src.astype(bf16), ca_w_ref[0],
                       preferred_element_type=f32) + ca_b_ref[0:1, :]
        k_ca = jnp.dot(k_src.astype(bf16), ca_w_ref[1],
                       preferred_element_type=f32) + ca_b_ref[1:2, :]
        v_ca = jnp.dot(mem.astype(bf16), ca_w_ref[2],
                       preferred_element_type=f32) + ca_b_ref[2:3, :]
        bias = bias_ref[...].astype(f32) if has_bias else None        # (1, 1, HWp)
        ctx, probs = attend(q_ca, k_ca, v_ca, bias, want_probs=True)
        ca_out = jnp.dot(ctx.astype(bf16), ca_w_ref[3],
                         preferred_element_type=f32) + ca_b_ref[3:4, :]
        x = layer_norm(x + ca_out, 1)

        # ---- FFN: linear1 -> relu -> linear2, residual, norm3 ----
        h1 = jnp.dot(x.astype(bf16), w1_ref[...],
                     preferred_element_type=f32) + b1_ref[...]
        h1 = jnp.maximum(h1, 0.0)
        ff = jnp.dot(h1.astype(bf16), w2_ref[...],
                     preferred_element_type=f32) + b2_ref[...]
        x = layer_norm(x + ff, 2)

        out_ref[0] = x.astype(out_ref.dtype)
        attn_ref[0] = probs.astype(attn_ref.dtype)

    return kernel


# --------------------------------- wrapper ------------------------------------

def decoder_layer_forward(params, tgt, memory,
                          memory_key_padding_mask=None,
                          pos=None, query_pos=None, *, nhead, eps=1e-5):
    """DETR TransformerDecoderLayer.forward_post (eval). Returns (tgt_out, attn_weight)."""
    Q, N, C = tgt.shape
    HW = memory.shape[0]
    dtype = tgt.dtype

    # Lane-dense key axis: pad HW up to a multiple of 128 so the (Q, HWp)
    # attention-weight stores and cross-attn scores use unmasked full-width
    # vector stores; padded keys are removed from the softmax via the bias.
    HWp = ((HW + 127) // 128) * 128
    pad_k = HWp - HW

    # TODO(synk): in a full DETR stack keep activations batch-major end-to-end so
    # these boundary transposes (extra HBM round trips) disappear.
    tgt_b = jnp.transpose(tgt, (1, 0, 2))                 # (N, Q, C)
    mem_b = jnp.transpose(memory, (1, 0, 2))              # (N, HW, C)
    if pad_k:
        mem_b = jnp.pad(mem_b, ((0, 0), (0, pad_k), (0, 0)))

    has_pos = pos is not None
    has_qpos = query_pos is not None
    has_bias = (memory_key_padding_mask is not None) or (pad_k > 0)

    data_in = [tgt_b, mem_b]
    data_specs = [pl.BlockSpec((1, Q, C), lambda n: (n, 0, 0)),
                  pl.BlockSpec((1, HWp, C), lambda n: (n, 0, 0))]
    if has_pos:
        pos_b = jnp.transpose(pos, (1, 0, 2))
        if pad_k:
            pos_b = jnp.pad(pos_b, ((0, 0), (0, pad_k), (0, 0)))
        data_in.append(pos_b)
        data_specs.append(pl.BlockSpec((1, HWp, C), lambda n: (n, 0, 0)))
    if has_qpos:
        qpos_b = jnp.transpose(query_pos, (1, 0, 2))
        data_in.append(qpos_b)
        data_specs.append(pl.BlockSpec((1, Q, C), lambda n: (n, 0, 0)))
    if has_bias:
        # Tiny (N, 1, HWp) additive bias; the (N*H, Lq, Lk) tensor is never built.
        if memory_key_padding_mask is not None:
            invalid = jnp.pad(memory_key_padding_mask.astype(bool),
                              ((0, 0), (0, pad_k)), constant_values=True)
        else:
            invalid = jnp.broadcast_to(jnp.arange(HWp) >= HW, (N, HWp))
        bias = jnp.where(invalid[:, None, :], jnp.float32(-1e9), jnp.float32(0.0))
        data_in.append(bias)
        data_specs.append(pl.BlockSpec((1, 1, HWp), lambda n: (n, 0, 0)))

    weight_names = ["sa_wqk", "sa_bqk", "sa_wv", "sa_bv", "sa_wo", "sa_bo",
                    "ca_w", "ca_b", "w1", "b1", "w2", "b2", "ln_g", "ln_b"]
    weights = [params[k] for k in weight_names]

    def _whole(a):
        # Whole array, constant block index -> DMA'd once, VMEM-resident (bf16).
        # TODO(synk): mark these single-buffered (pipeline_mode=pl.Buffered(1))
        # once that path is exercised on the target JAX version.
        nd = a.ndim
        return pl.BlockSpec(a.shape, lambda n, _nd=nd: (0,) * _nd)

    weight_specs = [_whole(a) for a in weights]

    kernel = _make_decoder_layer_kernel(nhead=nhead, eps=eps, has_pos=has_pos,
                                        has_qpos=has_qpos, has_bias=has_bias)

    out_b, attn_w = pl.pallas_call(
        kernel,
        grid=(N,),
        in_specs=data_specs + weight_specs,
        out_specs=[pl.BlockSpec((1, Q, C), lambda n: (n, 0, 0)),
                   pl.BlockSpec((1, Q, HWp), lambda n: (n, 0, 0))],
        out_shape=[jax.ShapeDtypeStruct((N, Q, C), dtype),
                   jax.ShapeDtypeStruct((N, Q, HWp), jnp.float32)],
        compiler_params=pltpu.CompilerParams(
            dimension_semantics=("parallel",),            # batch across TCs (v7x)
            vmem_limit_bytes=48 * 1024 * 1024),
        # TODO(synk): when N == 1, add a Q-tile grid axis so both v7x TensorCores
        # get work (queries attend over full keys, so Q-tiling is legal).
    )(*data_in, *weights)

    return jnp.transpose(out_b, (1, 0, 2)), attn_w[:, :, :HW]   # (Q,N,C), (N,Q,HW)


# ------------------------------ parameter utils --------------------------------

def init_torch_decoder_layer_params(key, d_model, dim_feedforward):
    """Parameters in native PyTorch layouts (as nn.TransformerDecoderLayer stores them)."""
    ks = jax.random.split(key, 4)

    def mha_params(k):
        k1, k2, k3, k4 = jax.random.split(k, 4)
        return dict(
            in_proj_weight=jax.random.normal(k1, (3 * d_model, d_model), jnp.float32) * 0.05,
            in_proj_bias=jax.random.normal(k2, (3 * d_model,), jnp.float32) * 0.02,
            out_proj_weight=jax.random.normal(k3, (d_model, d_model), jnp.float32) * 0.05,
            out_proj_bias=jax.random.normal(k4, (d_model,), jnp.float32) * 0.02,
        )

    return dict(
        self_attn=mha_params(ks[0]),
        multihead_attn=mha_params(ks[1]),
        linear1_weight=jax.random.normal(ks[2], (dim_feedforward, d_model), jnp.float32) * 0.05,
        linear1_bias=jnp.zeros((dim_feedforward,), jnp.float32),
        linear2_weight=jax.random.normal(ks[3], (d_model, dim_feedforward), jnp.float32) * 0.05,
        linear2_bias=jnp.zeros((d_model,), jnp.float32),
        norm1_weight=jnp.ones((d_model,), jnp.float32),
        norm1_bias=jnp.zeros((d_model,), jnp.float32),
        norm2_weight=jnp.ones((d_model,), jnp.float32),
        norm2_bias=jnp.zeros((d_model,), jnp.float32),
        norm3_weight=jnp.ones((d_model,), jnp.float32),
        norm3_bias=jnp.zeros((d_model,), jnp.float32),
    )


def prepare_layer_params(tp, d_model, *, weight_dtype=jnp.bfloat16):
    """One-time repack: transpose weights to (in, out), split fused QKV, fuse the
    self-attention Q||K weights, and store matmul weights in bf16 (MXU operands).
    Biases and LayerNorm params stay f32 (elementwise path)."""
    C = d_model

    def split_in_proj(m):
        w, b = m["in_proj_weight"], m["in_proj_bias"]
        return (w[:C].T, w[C:2 * C].T, w[2 * C:].T, b[:C], b[C:2 * C], b[2 * C:])

    wq, wk, wv, bq, bk, bv = split_in_proj(tp["self_attn"])
    sa_wqk = jnp.concatenate([wq, wk], axis=1).astype(weight_dtype)      # (C, 2C)
    sa_bqk = jnp.concatenate([bq, bk])[None, :].astype(jnp.float32)      # (1, 2C)

    cwq, cwk, cwv, cbq, cbk, cbv = split_in_proj(tp["multihead_attn"])
    ca_w = jnp.stack([cwq, cwk, cwv,
                      tp["multihead_attn"]["out_proj_weight"].T], 0).astype(weight_dtype)
    ca_b = jnp.stack([cbq, cbk, cbv,
                      tp["multihead_attn"]["out_proj_bias"]], 0).astype(jnp.float32)

    return dict(
        sa_wqk=sa_wqk, sa_bqk=sa_bqk,
        sa_wv=wv.astype(weight_dtype), sa_bv=bv[None, :].astype(jnp.float32),
        sa_wo=tp["self_attn"]["out_proj_weight"].T.astype(weight_dtype),
        sa_bo=tp["self_attn"]["out_proj_bias"][None, :].astype(jnp.float32),
        ca_w=ca_w, ca_b=ca_b,
        w1=tp["linear1_weight"].T.astype(weight_dtype),
        b1=tp["linear1_bias"][None, :].astype(jnp.float32),
        w2=tp["linear2_weight"].T.astype(weight_dtype),
        b2=tp["linear2_bias"][None, :].astype(jnp.float32),
        ln_g=jnp.stack([tp["norm1_weight"], tp["norm2_weight"], tp["norm3_weight"]], 0),
        ln_b=jnp.stack([tp["norm1_bias"], tp["norm2_bias"], tp["norm3_bias"]], 0),
    )


# --------------------------- pure-JAX f32 reference -----------------------------

def reference_forward(params, tgt, memory, memory_key_padding_mask,
                      pos, query_pos, *, nhead, eps=1e-5):
    """f32 reference using the same (bf16-rounded) packed weights."""
    f32 = jnp.float32
    C = tgt.shape[-1]
    H = nhead
    Dh = C // H

    tb = jnp.transpose(tgt, (1, 0, 2)).astype(f32)
    mb = jnp.transpose(memory, (1, 0, 2)).astype(f32)
    pb = jnp.transpose(pos, (1, 0, 2)).astype(f32) if pos is not None else 0.0
    qb = jnp.transpose(query_pos, (1, 0, 2)).astype(f32) if query_pos is not None else 0.0

    def ln(x, i):
        g = params["ln_g"][i].astype(f32)
        b = params["ln_b"][i].astype(f32)
        mu = x.mean(-1, keepdims=True)
        xc = x - mu
        var = (xc * xc).mean(-1, keepdims=True)
        return xc * jax.lax.rsqrt(var + eps) * g + b

    def mha(q_src, k_src, v_src, wq, bq, wk, bk, wv, bv, wo, bo, bias):
        q = q_src @ wq + bq
        k = k_src @ wk + bk
        v = v_src @ wv + bv
        N, Lq, _ = q.shape
        Lk = k.shape[1]
        q = q.reshape(N, Lq, H, Dh)
        k = k.reshape(N, Lk, H, Dh)
        v = v.reshape(N, Lk, H, Dh)
        s = jnp.einsum("nqhd,nkhd->nhqk", q, k) / math.sqrt(Dh)
        if bias is not None:
            s = s + bias
        p = jax.nn.softmax(s, axis=-1)
        o = jnp.einsum("nhqk,nkhd->nqhd", p, v).reshape(N, Lq, C)
        return o @ wo + bo, p.mean(axis=1)

    wqk = params["sa_wqk"].astype(f32)
    bqk = params["sa_bqk"].astype(f32)[0]
    sa_out, _ = mha(tb + qb, tb + qb, tb,
                    wqk[:, :C], bqk[:C], wqk[:, C:], bqk[C:],
                    params["sa_wv"].astype(f32), params["sa_bv"].astype(f32)[0],
                    params["sa_wo"].astype(f32), params["sa_bo"].astype(f32)[0], None)
    x = ln(tb + sa_out, 0)

    bias = None
    if memory_key_padding_mask is not None:
        bias = jnp.where(memory_key_padding_mask[:, None, None, :],
                         jnp.float32(-1e9), jnp.float32(0.0))
    caw = params["ca_w"].astype(f32)
    cab = params["ca_b"].astype(f32)
    ca_out, probs = mha(x + qb, mb + pb, mb,
                        caw[0], cab[0], caw[1], cab[1], caw[2], cab[2],
                        caw[3], cab[3], bias)
    x = ln(x + ca_out, 1)

    h = jnp.maximum(x @ params["w1"].astype(f32) + params["b1"].astype(f32), 0.0)
    ff = h @ params["w2"].astype(f32) + params["b2"].astype(f32)
    x = ln(x + ff, 2)
    return jnp.transpose(x, (1, 0, 2)), probs


# ----------------------------------- main ---------------------------------------

if __name__ == "__main__":
    Q, HW, N, C = 8, 16, 2, 32
    NHEAD, DFF = 4, 64

    root = jax.random.PRNGKey(0)
    k_in, k_params = jax.random.split(root)
    k_tgt, k_mem, k_pos, k_qpos = jax.random.split(k_in, 4)

    tgt = jax.random.normal(k_tgt, (Q, N, C), jnp.float32)
    memory = jax.random.normal(k_mem, (HW, N, C), jnp.float32)
    pos = jax.random.normal(k_pos, (HW, N, C), jnp.float32)
    query_pos = jax.random.normal(k_qpos, (Q, N, C), jnp.float32)

    # batch 0: no padding; batch 1: last 4 memory positions padded
    lengths = jnp.array([HW, HW - 4], jnp.int32)
    memory_key_padding_mask = jnp.arange(HW)[None, :] >= lengths[:, None]   # (N, HW)

    torch_params = init_torch_decoder_layer_params(k_params, C, DFF)
    params = prepare_layer_params(torch_params, C)     # one-time weight repack (bf16)

    fwd = jax.jit(functools.partial(decoder_layer_forward, nhead=NHEAD))

    out, attn_w = fwd(params, tgt, memory,
                      memory_key_padding_mask=memory_key_padding_mask,
                      pos=pos, query_pos=query_pos)
    out = jax.block_until_ready(out)
    attn_w = jax.block_until_ready(attn_w)

    assert out.shape == (Q, N, C), out.shape
    assert attn_w.shape == (N, Q, HW), attn_w.shape
    assert bool(jnp.all(jnp.isfinite(out)))
    assert bool(jnp.all(jnp.isfinite(attn_w)))
    # softmax rows normalize (exact reciprocal in-kernel)
    assert bool(jnp.allclose(attn_w.sum(-1), 1.0, atol=1e-3))
    # padded memory keys get zero attention in batch 1
    assert float(jnp.max(attn_w[1, :, HW - 4:])) < 1e-6

    # parity with an f32 reference using the same bf16-rounded weights
    ref_out, ref_attn = reference_forward(params, tgt, memory,
                                          memory_key_padding_mask, pos, query_pos,
                                          nhead=NHEAD)
    assert float(jnp.max(jnp.abs(out - ref_out))) < 5e-2
    assert float(jnp.max(jnp.abs(attn_w - ref_attn))) < 1e-2

    # exercise the no-mask / no-pos kernel variant (bias stays: HW padded to 128)
    out_nm, attn_nm = fwd(params, tgt, memory, memory_key_padding_mask=None,
                          pos=None, query_pos=None)
    out_nm = jax.block_until_ready(out_nm)
    attn_nm = jax.block_until_ready(attn_nm)
    assert out_nm.shape == (Q, N, C) and attn_nm.shape == (N, Q, HW)
    assert bool(jnp.all(jnp.isfinite(out_nm)))
    assert bool(jnp.all(jnp.isfinite(attn_nm)))

    print("KERNEL_OK")
</pallas_src>

<mosaic_0001>
module attributes {stable_mosaic.version = 11 : i64} {
  func.func @kernel(%arg0: i32, %arg1: memref<1x8x32xf32, #tpu.memory_space<vmem>>, %arg2: memref<1x128x32xf32, #tpu.memory_space<vmem>>, %arg3: memref<1x128x32xf32, #tpu.memory_space<vmem>>, %arg4: memref<1x8x32xf32, #tpu.memory_space<vmem>>, %arg5: memref<1x1x128xf32, #tpu.memory_space<vmem>>, %arg6: memref<32x64xbf16, #tpu.memory_space<vmem>>, %arg7: memref<1x64xf32, #tpu.memory_space<vmem>>, %arg8: memref<32x32xbf16, #tpu.memory_space<vmem>>, %arg9: memref<1x32xf32, #tpu.memory_space<vmem>>, %arg10: memref<32x32xbf16, #tpu.memory_space<vmem>>, %arg11: memref<1x32xf32, #tpu.memory_space<vmem>>, %arg12: memref<4x32x32xbf16, #tpu.memory_space<vmem>>, %arg13: memref<4x32xf32, #tpu.memory_space<vmem>>, %arg14: memref<32x64xbf16, #tpu.memory_space<vmem>>, %arg15: memref<1x64xf32, #tpu.memory_space<vmem>>, %arg16: memref<64x32xbf16, #tpu.memory_space<vmem>>, %arg17: memref<1x32xf32, #tpu.memory_space<vmem>>, %arg18: memref<3x32xf32, #tpu.memory_space<vmem>>, %arg19: memref<3x32xf32, #tpu.memory_space<vmem>>, %arg20: memref<1x8x32xf32, #tpu.memory_space<vmem>>, %arg21: memref<1x8x128xf32, #tpu.memory_space<vmem>>) attributes {dimension_semantics = [#tpu.dimension_semantics<parallel>], iteration_bounds = array<i64: 2>, scalar_prefetch = 0 : i64, scratch_operands = 0 : i64, tpu.core_type = #tpu.core_type<tc>, window_params = [{transform_indices = @transform_0, window_bounds = array<i64: 1, 8, 32>}, {transform_indices = @transform_1, window_bounds = array<i64: 1, 128, 32>}, {transform_indices = @transform_2, window_bounds = array<i64: 1, 128, 32>}, {transform_indices = @transform_3, window_bounds = array<i64: 1, 8, 32>}, {transform_indices = @transform_4, window_bounds = array<i64: 1, 1, 128>}, {pipeline_mode = #tpu.pipeline_mode<synchronous>, transform_indices = @transform_5, window_bounds = array<i64: 32, 64>}, {pipeline_mode = #tpu.pipeline_mode<synchronous>, transform_indices = @transform_6, window_bounds = array<i64: 1, 64>}, {pipeline_mode = #tpu.pipeline_mode<synchronous>, transform_indices = @transform_7, window_bounds = array<i64: 32, 32>}, {pipeline_mode = #tpu.pipeline_mode<synchronous>, transform_indices = @transform_8, window_bounds = array<i64: 1, 32>}, {pipeline_mode = #tpu.pipeline_mode<synchronous>, transform_indices = @transform_9, window_bounds = array<i64: 32, 32>}, {pipeline_mode = #tpu.pipeline_mode<synchronous>, transform_indices = @transform_10, window_bounds = array<i64: 1, 32>}, {pipeline_mode = #tpu.pipeline_mode<synchronous>, transform_indices = @transform_11, window_bounds = array<i64: 4, 32, 32>}, {pipeline_mode = #tpu.pipeline_mode<synchronous>, transform_indices = @transform_12, window_bounds = array<i64: 4, 32>}, {pipeline_mode = #tpu.pipeline_mode<synchronous>, transform_indices = @transform_13, window_bounds = array<i64: 32, 64>}, {pipeline_mode = #tpu.pipeline_mode<synchronous>, transform_indices = @transform_14, window_bounds = array<i64: 1, 64>}, {pipeline_mode = #tpu.pipeline_mode<synchronous>, transform_indices = @transform_15, window_bounds = array<i64: 64, 32>}, {pipeline_mode = #tpu.pipeline_mode<synchronous>, transform_indices = @transform_16, window_bounds = array<i64: 1, 32>}, {pipeline_mode = #tpu.pipeline_mode<synchronous>, transform_indices = @transform_17, window_bounds = array<i64: 3, 32>}, {pipeline_mode = #tpu.pipeline_mode<synchronous>, transform_indices = @transform_18, window_bounds = array<i64: 3, 32>}, {transform_indices = @transform_19, window_bounds = array<i64: 1, 8, 32>}, {transform_indices = @transform_20, window_bounds = array<i64: 1, 8, 128>}]} {
    %c0 = arith.constant 0 : index
    %c0_0 = arith.constant 0 : index
    %c0_1 = arith.constant 0 : index
    %0 = vector.load %arg1[%c0, %c0_0, %c0_1] : memref<1x8x32xf32, #tpu.memory_space<vmem>>, vector<1x8x32xf32>
    %1 = vector.shape_cast %0 : vector<1x8x32xf32> to vector<8x32xf32>
    %c0_2 = arith.constant 0 : index
    %c0_3 = arith.constant 0 : index
    %c0_4 = arith.constant 0 : index
    %2 = vector.load %arg2[%c0_2, %c0_3, %c0_4] : memref<1x128x32xf32, #tpu.memory_space<vmem>>, vector<1x128x32xf32>
    %3 = vector.shape_cast %2 : vector<1x128x32xf32> to vector<128x32xf32>
    %c0_5 = arith.constant 0 : index
    %c0_6 = arith.constant 0 : index
    %c0_7 = arith.constant 0 : index
    %4 = vector.load %arg4[%c0_5, %c0_6, %c0_7] : memref<1x8x32xf32, #tpu.memory_space<vmem>>, vector<1x8x32xf32>
    %5 = vector.shape_cast %4 : vector<1x8x32xf32> to vector<8x32xf32>
    %c0_8 = arith.constant 0 : index
    %c0_9 = arith.constant 0 : index
    %c0_10 = arith.constant 0 : index
    %6 = vector.load %arg3[%c0_8, %c0_9, %c0_10] : memref<1x128x32xf32, #tpu.memory_space<vmem>>, vector<1x128x32xf32>
    %7 = vector.shape_cast %6 : vector<1x128x32xf32> to vector<128x32xf32>
    %8 = arith.addf %1, %5 : vector<8x32xf32>
    %9 = arith.truncf %8 : vector<8x32xf32> to vector<8x32xbf16>
    %c0_11 = arith.constant 0 : index
    %c0_12 = arith.constant 0 : index
    %10 = vector.load %arg6[%c0_11, %c0_12] : memref<32x64xbf16, #tpu.memory_space<vmem>>, vector<32x64xbf16>
    %cst = arith.constant dense<0.000000e+00> : vector<8x64xf32>
    %11 = tpu.matmul %9, %10, %cst {dimension_numbers = #tpu.dot_dimension_numbers<[1], [0], [0], [1], [0, 0, 1, 1], [], []>} : vector<8x32xbf16>, vector<32x64xbf16>, vector<8x64xf32> -> vector<8x64xf32>
    %c0_13 = arith.constant 0 : index
    %c0_14 = arith.constant 0 : index
    %12 = vector.load %arg7[%c0_13, %c0_14] : memref<1x64xf32, #tpu.memory_space<vmem>>, vector<1x64xf32>
    %13 = vector.broadcast %12 : vector<1x64xf32> to vector<8x64xf32>
    %14 = arith.addf %11, %13 : vector<8x64xf32>
    %15 = arith.truncf %1 : vector<8x32xf32> to vector<8x32xbf16>
    %c0_15 = arith.constant 0 : index
    %c0_16 = arith.constant 0 : index
    %16 = vector.load %arg8[%c0_15, %c0_16] : memref<32x32xbf16, #tpu.memory_space<vmem>>, vector<32x32xbf16>
    %cst_17 = arith.constant dense<0.000000e+00> : vector<8x32xf32>
    %17 = tpu.matmul %15, %16, %cst_17 {dimension_numbers = #tpu.dot_dimension_numbers<[1], [0], [0], [1], [0, 0, 1, 1], [], []>} : vector<8x32xbf16>, vector<32x32xbf16>, vector<8x32xf32> -> vector<8x32xf32>
    %c0_18 = arith.constant 0 : index
    %c0_19 = arith.constant 0 : index
    %18 = vector.load %arg9[%c0_18, %c0_19] : memref<1x32xf32, #tpu.memory_space<vmem>>, vector<1x32xf32>
    %19 = vector.broadcast %18 : vector<1x32xf32> to vector<8x32xf32>
    %20 = arith.addf %17, %19 : vector<8x32xf32>
    %21 = vector.extract_strided_slice %14 {offsets = [0, 0], sizes = [8, 32], strides = [1, 1]} : vector<8x64xf32> to vector<8x32xf32>
    %22 = vector.extract_strided_slice %14 {offsets = [0, 32], sizes = [8, 32], strides = [1, 1]} : vector<8x64xf32> to vector<8x32xf32>
    %23 = vector.extract_strided_slice %21 {offsets = [0, 0], sizes = [8, 8], strides = [1, 1]} : vector<8x32xf32> to vector<8x8xf32>
    %24 = vector.extract_strided_slice %21 {offsets = [0, 8], sizes = [8, 8], strides = [1, 1]} : vector<8x32xf32> to vector<8x8xf32>
    %25 = vector.extract_strided_slice %21 {offsets = [0, 16], sizes = [8, 8], strides = [1, 1]} : vector<8x32xf32> to vector<8x8xf32>
    %26 = vector.extract_strided_slice %21 {offsets = [0, 24], sizes = [8, 8], strides = [1, 1]} : vector<8x32xf32> to vector<8x8xf32>
    %27 = vector.shape_cast %23 : vector<8x8xf32> to vector<1x8x8xf32>
    %28 = vector.shape_cast %24 : vector<8x8xf32> to vector<1x8x8xf32>
    %29 = vector.shape_cast %25 : vector<8x8xf32> to vector<1x8x8xf32>
    %30 = vector.shape_cast %26 : vector<8x8xf32> to vector<1x8x8xf32>
    %31 = tpu.concatenate %27, %28, %29, %30 in 0 : vector<1x8x8xf32>, vector<1x8x8xf32>, vector<1x8x8xf32>, vector<1x8x8xf32> -> vector<4x8x8xf32>
    %32 = arith.truncf %31 : vector<4x8x8xf32> to vector<4x8x8xbf16>
    %33 = vector.extract_strided_slice %22 {offsets = [0, 0], sizes = [8, 8], strides = [1, 1]} : vector<8x32xf32> to vector<8x8xf32>
    %34 = vector.extract_strided_slice %22 {offsets = [0, 8], sizes = [8, 8], strides = [1, 1]} : vector<8x32xf32> to vector<8x8xf32>
    %35 = vector.extract_strided_slice %22 {offsets = [0, 16], sizes = [8, 8], strides = [1, 1]} : vector<8x32xf32> to vector<8x8xf32>
    %36 = vector.extract_strided_slice %22 {offsets = [0, 24], sizes = [8, 8], strides = [1, 1]} : vector<8x32xf32> to vector<8x8xf32>
    %37 = vector.shape_cast %33 : vector<8x8xf32> to vector<1x8x8xf32>
    %38 = vector.shape_cast %34 : vector<8x8xf32> to vector<1x8x8xf32>
    %39 = vector.shape_cast %35 : vector<8x8xf32> to vector<1x8x8xf32>
    %40 = vector.shape_cast %36 : vector<8x8xf32> to vector<1x8x8xf32>
    %41 = tpu.concatenate %37, %38, %39, %40 in 0 : vector<1x8x8xf32>, vector<1x8x8xf32>, vector<1x8x8xf32>, vector<1x8x8xf32> -> vector<4x8x8xf32>
    %42 = arith.truncf %41 : vector<4x8x8xf32> to vector<4x8x8xbf16>
    %43 = vector.extract_strided_slice %20 {offsets = [0, 0], sizes = [8, 8], strides = [1, 1]} : vector<8x32xf32> to vector<8x8xf32>
    %44 = vector.extract_strided_slice %20 {offsets = [0, 8], sizes = [8, 8], strides = [1, 1]} : vector<8x32xf32> to vector<8x8xf32>
    %45 = vector.extract_strided_slice %20 {offsets = [0, 16], sizes = [8, 8], strides = [1, 1]} : vector<8x32xf32> to vector<8x8xf32>
    %46 = vector.extract_strided_slice %20 {offsets = [0, 24], sizes = [8, 8], strides = [1, 1]} : vector<8x32xf32> to vector<8x8xf32>
    %47 = vector.shape_cast %43 : vector<8x8xf32> to vector<1x8x8xf32>
    %48 = vector.shape_cast %44 : vector<8x8xf32> to vector<1x8x8xf32>
    %49 = vector.shape_cast %45 : vector<8x8xf32> to vector<1x8x8xf32>
    %50 = vector.shape_cast %46 : vector<8x8xf32> to vector<1x8x8xf32>
    %51 = tpu.concatenate %47, %48, %49, %50 in 0 : vector<1x8x8xf32>, vector<1x8x8xf32>, vector<1x8x8xf32>, vector<1x8x8xf32> -> vector<4x8x8xf32>
    %52 = arith.truncf %51 : vector<4x8x8xf32> to vector<4x8x8xbf16>
    "tpu.trace_start"() <{level = 10 : i32, message = "hqd,hkd->hqk"}> : () -> ()
    %cst_20 = arith.constant dense<0.000000e+00> : vector<4x8x8xf32>
    %53 = tpu.matmul %32, %42, %cst_20 {dimension_numbers = #tpu.dot_dimension_numbers<[2], [2], [1], [1], [0, 0, 0, 1, 1, 1], [0], [0]>} : vector<4x8x8xbf16>, vector<4x8x8xbf16>, vector<4x8x8xf32> -> vector<4x8x8xf32>
    "tpu.trace_stop"() : () -> ()
    %cst_21 = arith.constant 0.353553385 : f32
    %54 = vector.broadcast %cst_21 : f32 to vector<4x8x8xf32>
    %55 = arith.mulf %53, %54 : vector<4x8x8xf32>
    %cst_22 = arith.constant dense<0xFF800000> : vector<4x8xf32>
    %56 = vector.multi_reduction <maximumf>, %55, %cst_22 [2] : vector<4x8x8xf32> to vector<4x8xf32>
    %57 = vector.shape_cast %56 : vector<4x8xf32> to vector<4x8x1xf32>
    %58 = vector.broadcast %57 : vector<4x8x1xf32> to vector<4x8x8xf32>
    %59 = arith.subf %55, %58 : vector<4x8x8xf32>
    %60 = math.exp %59 : vector<4x8x8xf32>
    %cst_23 = arith.constant dense<0.000000e+00> : vector<4x8xf32>
    %61 = vector.multi_reduction <add>, %60, %cst_23 [2] : vector<4x8x8xf32> to vector<4x8xf32>
    %62 = vector.shape_cast %61 : vector<4x8xf32> to vector<4x8x1xf32>
    %cst_24 = arith.constant 1.000000e+00 : f32
    %63 = vector.broadcast %cst_24 : f32 to vector<4x8x1xf32>
    %64 = arith.divf %63, %62 : vector<4x8x1xf32>
    %65 = arith.truncf %60 : vector<4x8x8xf32> to vector<4x8x8xbf16>
    "tpu.trace_start"() <{level = 10 : i32, message = "hqk,hkd->hqd"}> : () -> ()
    %cst_25 = arith.constant dense<0.000000e+00> : vector<4x8x8xf32>
    %66 = tpu.matmul %65, %52, %cst_25 {dimension_numbers = #tpu.dot_dimension_numbers<[2], [1], [1], [2], [0, 0, 0, 1, 1, 2], [0], [0]>} : vector<4x8x8xbf16>, vector<4x8x8xbf16>, vector<4x8x8xf32> -> vector<4x8x8xf32>
    "tpu.trace_stop"() : () -> ()
    %67 = vector.broadcast %64 : vector<4x8x1xf32> to vector<4x8x8xf32>
    %68 = arith.mulf %66, %67 : vector<4x8x8xf32>
    %69 = vector.extract_strided_slice %68 {offsets = [0, 0, 0], sizes = [1, 8, 8], strides = [1, 1, 1]} : vector<4x8x8xf32> to vector<1x8x8xf32>
    %70 = vector.shape_cast %69 : vector<1x8x8xf32> to vector<8x8xf32>
    %71 = vector.extract_strided_slice %68 {offsets = [1, 0, 0], sizes = [1, 8, 8], strides = [1, 1, 1]} : vector<4x8x8xf32> to vector<1x8x8xf32>
    %72 = vector.shape_cast %71 : vector<1x8x8xf32> to vector<8x8xf32>
    %73 = vector.extract_strided_slice %68 {offsets = [2, 0, 0], sizes = [1, 8, 8], strides = [1, 1, 1]} : vector<4x8x8xf32> to vector<1x8x8xf32>
    %74 = vector.shape_cast %73 : vector<1x8x8xf32> to vector<8x8xf32>
    %75 = vector.extract_strided_slice %68 {offsets = [3, 0, 0], sizes = [1, 8, 8], strides = [1, 1, 1]} : vector<4x8x8xf32> to vector<1x8x8xf32>
    %76 = vector.shape_cast %75 : vector<1x8x8xf32> to vector<8x8xf32>
    %77 = tpu.concatenate %70, %72, %74, %76 in 1 : vector<8x8xf32>, vector<8x8xf32>, vector<8x8xf32>, vector<8x8xf32> -> vector<8x32xf32>
    %78 = arith.truncf %77 : vector<8x32xf32> to vector<8x32xbf16>
    %c0_26 = arith.constant 0 : index
    %c0_27 = arith.constant 0 : index
    %79 = vector.load %arg10[%c0_26, %c0_27] : memref<32x32xbf16, #tpu.memory_space<vmem>>, vector<32x32xbf16>
    %cst_28 = arith.constant dense<0.000000e+00> : vector<8x32xf32>
    %80 = tpu.matmul %78, %79, %cst_28 {dimension_numbers = #tpu.dot_dimension_numbers<[1], [0], [0], [1], [0, 0, 1, 1], [], []>} : vector<8x32xbf16>, vector<32x32xbf16>, vector<8x32xf32> -> vector<8x32xf32>
    %c0_29 = arith.constant 0 : index
    %c0_30 = arith.constant 0 : index
    %81 = vector.load %arg11[%c0_29, %c0_30] : memref<1x32xf32, #tpu.memory_space<vmem>>, vector<1x32xf32>
    %82 = vector.broadcast %81 : vector<1x32xf32> to vector<8x32xf32>
    %83 = arith.addf %80, %82 : vector<8x32xf32>
    %84 = arith.addf %1, %83 : vector<8x32xf32>
    %c0_31 = arith.constant 0 : index
    %c0_32 = arith.constant 0 : index
    %85 = vector.load %arg18[%c0_31, %c0_32] : memref<3x32xf32, #tpu.memory_space<vmem>>, vector<1x32xf32>
    %c0_33 = arith.constant 0 : index
    %c0_34 = arith.constant 0 : index
    %86 = vector.load %arg19[%c0_33, %c0_34] : memref<3x32xf32, #tpu.memory_space<vmem>>, vector<1x32xf32>
    %cst_35 = arith.constant dense<0.000000e+00> : vector<8xf32>
    %87 = vector.multi_reduction <add>, %84, %cst_35 [1] : vector<8x32xf32> to vector<8xf32>
    %88 = vector.shape_cast %87 : vector<8xf32> to vector<8x1xf32>
    %cst_36 = arith.constant 3.200000e+01 : f32
    %89 = vector.broadcast %cst_36 : f32 to vector<8x1xf32>
    %90 = arith.divf %88, %89 : vector<8x1xf32>
    %91 = vector.broadcast %90 : vector<8x1xf32> to vector<8x32xf32>
    %92 = arith.subf %84, %91 : vector<8x32xf32>
    %93 = arith.mulf %92, %92 : vector<8x32xf32>
    %cst_37 = arith.constant dense<0.000000e+00> : vector<8xf32>
    %94 = vector.multi_reduction <add>, %93, %cst_37 [1] : vector<8x32xf32> to vector<8xf32>
    %95 = vector.shape_cast %94 : vector<8xf32> to vector<8x1xf32>
    %cst_38 = arith.constant 3.200000e+01 : f32
    %96 = vector.broadcast %cst_38 : f32 to vector<8x1xf32>
    %97 = arith.divf %95, %96 : vector<8x1xf32>
    %cst_39 = arith.constant 9.99999974E-6 : f32
    %98 = vector.broadcast %cst_39 : f32 to vector<8x1xf32>
    %99 = arith.addf %97, %98 : vector<8x1xf32>
    %100 = math.rsqrt %99 : vector<8x1xf32>
    %101 = vector.broadcast %100 : vector<8x1xf32> to vector<8x32xf32>
    %102 = arith.mulf %92, %101 : vector<8x32xf32>
    %103 = vector.broadcast %85 : vector<1x32xf32> to vector<8x32xf32>
    %104 = arith.mulf %102, %103 : vector<8x32xf32>
    %105 = vector.broadcast %86 : vector<1x32xf32> to vector<8x32xf32>
    %106 = arith.addf %104, %105 : vector<8x32xf32>
    %107 = arith.addf %106, %5 : vector<8x32xf32>
    %108 = arith.addf %3, %7 : vector<128x32xf32>
    %109 = arith.truncf %107 : vector<8x32xf32> to vector<8x32xbf16>
    %c0_40 = arith.constant 0 : index
    %c0_41 = arith.constant 0 : index
    %c0_42 = arith.constant 0 : index
    %110 = vector.load %arg12[%c0_40, %c0_41, %c0_42] : memref<4x32x32xbf16, #tpu.memory_space<vmem>>, vector<1x32x32xbf16>
    %111 = vector.shape_cast %110 : vector<1x32x32xbf16> to vector<32x32xbf16>
    %cst_43 = arith.constant dense<0.000000e+00> : vector<8x32xf32>
    %112 = tpu.matmul %109, %111, %cst_43 {dimension_numbers = #tpu.dot_dimension_numbers<[1], [0], [0], [1], [0, 0, 1, 1], [], []>} : vector<8x32xbf16>, vector<32x32xbf16>, vector<8x32xf32> -> vector<8x32xf32>
    %c0_44 = arith.constant 0 : index
    %c0_45 = arith.constant 0 : index
    %113 = vector.load %arg13[%c0_44, %c0_45] : memref<4x32xf32, #tpu.memory_space<vmem>>, vector<1x32xf32>
    %114 = vector.broadcast %113 : vector<1x32xf32> to vector<8x32xf32>
    %115 = arith.addf %112, %114 : vector<8x32xf32>
    %116 = arith.truncf %108 : vector<128x32xf32> to vector<128x32xbf16>
    %c1 = arith.constant 1 : index
    %c0_46 = arith.constant 0 : index
    %c0_47 = arith.constant 0 : index
    %117 = vector.load %arg12[%c1, %c0_46, %c0_47] : memref<4x32x32xbf16, #tpu.memory_space<vmem>>, vector<1x32x32xbf16>
    %118 = vector.shape_cast %117 : vector<1x32x32xbf16> to vector<32x32xbf16>
    %cst_48 = arith.constant dense<0.000000e+00> : vector<128x32xf32>
    %119 = tpu.matmul %116, %118, %cst_48 {dimension_numbers = #tpu.dot_dimension_numbers<[1], [0], [0], [1], [0, 0, 1, 1], [], []>} : vector<128x32xbf16>, vector<32x32xbf16>, vector<128x32xf32> -> vector<128x32xf32>
    %c1_49 = arith.constant 1 : index
    %c0_50 = arith.constant 0 : index
    %120 = vector.load %arg13[%c1_49, %c0_50] : memref<4x32xf32, #tpu.memory_space<vmem>>, vector<1x32xf32>
    %121 = vector.broadcast %120 : vector<1x32xf32> to vector<128x32xf32>
    %122 = arith.addf %119, %121 : vector<128x32xf32>
    %123 = arith.truncf %3 : vector<128x32xf32> to vector<128x32xbf16>
    %c2 = arith.constant 2 : index
    %c0_51 = arith.constant 0 : index
    %c0_52 = arith.constant 0 : index
    %124 = vector.load %arg12[%c2, %c0_51, %c0_52] : memref<4x32x32xbf16, #tpu.memory_space<vmem>>, vector<1x32x32xbf16>
    %125 = vector.shape_cast %124 : vector<1x32x32xbf16> to vector<32x32xbf16>
    %cst_53 = arith.constant dense<0.000000e+00> : vector<128x32xf32>
    %126 = tpu.matmul %123, %125, %cst_53 {dimension_numbers = #tpu.dot_dimension_numbers<[1], [0], [0], [1], [0, 0, 1, 1], [], []>} : vector<128x32xbf16>, vector<32x32xbf16>, vector<128x32xf32> -> vector<128x32xf32>
    %c2_54 = arith.constant 2 : index
    %c0_55 = arith.constant 0 : index
    %127 = vector.load %arg13[%c2_54, %c0_55] : memref<4x32xf32, #tpu.memory_space<vmem>>, vector<1x32xf32>
    %128 = vector.broadcast %127 : vector<1x32xf32> to vector<128x32xf32>
    %129 = arith.addf %126, %128 : vector<128x32xf32>
    %c0_56 = arith.constant 0 : index
    %c0_57 = arith.constant 0 : index
    %c0_58 = arith.constant 0 : index
    %130 = vector.load %arg5[%c0_56, %c0_57, %c0_58] : memref<1x1x128xf32, #tpu.memory_space<vmem>>, vector<1x1x128xf32>
    %131 = vector.extract_strided_slice %115 {offsets = [0, 0], sizes = [8, 8], strides = [1, 1]} : vector<8x32xf32> to vector<8x8xf32>
    %132 = vector.extract_strided_slice %115 {offsets = [0, 8], sizes = [8, 8], strides = [1, 1]} : vector<8x32xf32> to vector<8x8xf32>
    %133 = vector.extract_strided_slice %115 {offsets = [0, 16], sizes = [8, 8], strides = [1, 1]} : vector<8x32xf32> to vector<8x8xf32>
    %134 = vector.extract_strided_slice %115 {offsets = [0, 24], sizes = [8, 8], strides = [1, 1]} : vector<8x32xf32> to vector<8x8xf32>
    %135 = vector.shape_cast %131 : vector<8x8xf32> to vector<1x8x8xf32>
    %136 = vector.shape_cast %132 : vector<8x8xf32> to vector<1x8x8xf32>
    %137 = vector.shape_cast %133 : vector<8x8xf32> to vector<1x8x8xf32>
    %138 = vector.shape_cast %134 : vector<8x8xf32> to vector<1x8x8xf32>
    %139 = tpu.concatenate %135, %136, %137, %138 in 0 : vector<1x8x8xf32>, vector<1x8x8xf32>, vector<1x8x8xf32>, vector<1x8x8xf32> -> vector<4x8x8xf32>
    %140 = arith.truncf %139 : vector<4x8x8xf32> to vector<4x8x8xbf16>
    %141 = vector.extract_strided_slice %122 {offsets = [0, 0], sizes = [128, 8], strides = [1, 1]} : vector<128x32xf32> to vector<128x8xf32>
    %142 = vector.extract_strided_slice %122 {offsets = [0, 8], sizes = [128, 8], strides = [1, 1]} : vector<128x32xf32> to vector<128x8xf32>
    %143 = vector.extract_strided_slice %122 {offsets = [0, 16], sizes = [128, 8], strides = [1, 1]} : vector<128x32xf32> to vector<128x8xf32>
    %144 = vector.extract_strided_slice %122 {offsets = [0, 24], sizes = [128, 8], strides = [1, 1]} : vector<128x32xf32> to vector<128x8xf32>
    %145 = vector.shape_cast %141 : vector<128x8xf32> to vector<1x128x8xf32>
    %146 = vector.shape_cast %142 : vector<128x8xf32> to vector<1x128x8xf32>
    %147 = vector.shape_cast %143 : vector<128x8xf32> to vector<1x128x8xf32>
    %148 = vector.shape_cast %144 : vector<128x8xf32> to vector<1x128x8xf32>
    %149 = tpu.concatenate %145, %146, %147, %148 in 0 : vector<1x128x8xf32>, vector<1x128x8xf32>, vector<1x128x8xf32>, vector<1x128x8xf32> -> vector<4x128x8xf32>
    %150 = arith.truncf %149 : vector<4x128x8xf32> to vector<4x128x8xbf16>
    %151 = vector.extract_strided_slice %129 {offsets = [0, 0], sizes = [128, 8], strides = [1, 1]} : vector<128x32xf32> to vector<128x8xf32>
    %152 = vector.extract_strided_slice %129 {offsets = [0, 8], sizes = [128, 8], strides = [1, 1]} : vector<128x32xf32> to vector<128x8xf32>
    %153 = vector.extract_strided_slice %129 {offsets = [0, 16], sizes = [128, 8], strides = [1, 1]} : vector<128x32xf32> to vector<128x8xf32>
    %154 = vector.extract_strided_slice %129 {offsets = [0, 24], sizes = [128, 8], strides = [1, 1]} : vector<128x32xf32> to vector<128x8xf32>
    %155 = vector.shape_cast %151 : vector<128x8xf32> to vector<1x128x8xf32>
    %156 = vector.shape_cast %152 : vector<128x8xf32> to vector<1x128x8xf32>
    %157 = vector.shape_cast %153 : vector<128x8xf32> to vector<1x128x8xf32>
    %158 = vector.shape_cast %154 : vector<128x8xf32> to vector<1x128x8xf32>
    %159 = tpu.concatenate %155, %156, %157, %158 in 0 : vector<1x128x8xf32>, vector<1x128x8xf32>, vector<1x128x8xf32>, vector<1x128x8xf32> -> vector<4x128x8xf32>
    %160 = arith.truncf %159 : vector<4x128x8xf32> to vector<4x128x8xbf16>
    "tpu.trace_start"() <{level = 10 : i32, message = "hqd,hkd->hqk"}> : () -> ()
    %cst_59 = arith.constant dense<0.000000e+00> : vector<4x8x128xf32>
    %161 = tpu.matmul %140, %150, %cst_59 {dimension_numbers = #tpu.dot_dimension_numbers<[2], [2], [1], [1], [0, 0, 0, 1, 1, 1], [0], [0]>} : vector<4x8x8xbf16>, vector<4x128x8xbf16>, vector<4x8x128xf32> -> vector<4x8x128xf32>
    "tpu.trace_stop"() : () -> ()
    %cst_60 = arith.constant 0.353553385 : f32
    %162 = vector.broadcast %cst_60 : f32 to vector<4x8x128xf32>
    %163 = arith.mulf %161, %162 : vector<4x8x128xf32>
    %164 = vector.broadcast %130 : vector<1x1x128xf32> to vector<4x8x128xf32>
    %165 = arith.addf %163, %164 : vector<4x8x128xf32>
    %cst_61 = arith.constant dense<0xFF800000> : vector<4x8xf32>
    %166 = vector.multi_reduction <maximumf>, %165, %cst_61 [2] : vector<4x8x128xf32> to vector<4x8xf32>
    %167 = vector.shape_cast %166 : vector<4x8xf32> to vector<4x8x1xf32>
    %168 = vector.broadcast %167 : vector<4x8x1xf32> to vector<4x8x128xf32>
    %169 = arith.subf %165, %168 : vector<4x8x128xf32>
    %170 = math.exp %169 : vector<4x8x128xf32>
    %cst_62 = arith.constant dense<0.000000e+00> : vector<4x8xf32>
    %171 = vector.multi_reduction <add>, %170, %cst_62 [2] : vector<4x8x128xf32> to vector<4x8xf32>
    %172 = vector.shape_cast %171 : vector<4x8xf32> to vector<4x8x1xf32>
    %cst_63 = arith.constant 1.000000e+00 : f32
    %173 = vector.broadcast %cst_63 : f32 to vector<4x8x1xf32>
    %174 = arith.divf %173, %172 : vector<4x8x1xf32>
    %175 = vector.broadcast %174 : vector<4x8x1xf32> to vector<4x8x128xf32>
    %176 = arith.mulf %170, %175 : vector<4x8x128xf32>
    %177 = arith.truncf %176 : vector<4x8x128xf32> to vector<4x8x128xbf16>
    "tpu.trace_start"() <{level = 10 : i32, message = "hqk,hkd->hqd"}> : () -> ()
    %cst_64 = arith.constant dense<0.000000e+00> : vector<4x8x8xf32>
    %178 = tpu.matmul %177, %160, %cst_64 {dimension_numbers = #tpu.dot_dimension_numbers<[2], [1], [1], [2], [0, 0, 0, 1, 1, 2], [0], [0]>} : vector<4x8x128xbf16>, vector<4x128x8xbf16>, vector<4x8x8xf32> -> vector<4x8x8xf32>
    "tpu.trace_stop"() : () -> ()
    %179 = vector.extract_strided_slice %176 {offsets = [0, 0, 0], sizes = [1, 8, 128], strides = [1, 1, 1]} : vector<4x8x128xf32> to vector<1x8x128xf32>
    %180 = vector.shape_cast %179 : vector<1x8x128xf32> to vector<8x128xf32>
    %181 = vector.extract_strided_slice %176 {offsets = [1, 0, 0], sizes = [1, 8, 128], strides = [1, 1, 1]} : vector<4x8x128xf32> to vector<1x8x128xf32>
    %182 = vector.shape_cast %181 : vector<1x8x128xf32> to vector<8x128xf32>
    %183 = arith.addf %180, %182 : vector<8x128xf32>
    %184 = vector.extract_strided_slice %176 {offsets = [2, 0, 0], sizes = [1, 8, 128], strides = [1, 1, 1]} : vector<4x8x128xf32> to vector<1x8x128xf32>
    %185 = vector.shape_cast %184 : vector<1x8x128xf32> to vector<8x128xf32>
    %186 = arith.addf %183, %185 : vector<8x128xf32>
    %187 = vector.extract_strided_slice %176 {offsets = [3, 0, 0], sizes = [1, 8, 128], strides = [1, 1, 1]} : vector<4x8x128xf32> to vector<1x8x128xf32>
    %188 = vector.shape_cast %187 : vector<1x8x128xf32> to vector<8x128xf32>
    %189 = arith.addf %186, %188 : vector<8x128xf32>
    %cst_65 = arith.constant 2.500000e-01 : f32
    %190 = vector.broadcast %cst_65 : f32 to vector<8x128xf32>
    %191 = arith.mulf %189, %190 : vector<8x128xf32>
    %192 = vector.extract_strided_slice %178 {offsets = [0, 0, 0], sizes = [1, 8, 8], strides = [1, 1, 1]} : vector<4x8x8xf32> to vector<1x8x8xf32>
    %193 = vector.shape_cast %192 : vector<1x8x8xf32> to vector<8x8xf32>
    %194 = vector.extract_strided_slice %178 {offsets = [1, 0, 0], sizes = [1, 8, 8], strides = [1, 1, 1]} : vector<4x8x8xf32> to vector<1x8x8xf32>
    %195 = vector.shape_cast %194 : vector<1x8x8xf32> to vector<8x8xf32>
    %196 = vector.extract_strided_slice %178 {offsets = [2, 0, 0], sizes = [1, 8, 8], strides = [1, 1, 1]} : vector<4x8x8xf32> to vector<1x8x8xf32>
    %197 = vector.shape_cast %196 : vector<1x8x8xf32> to vector<8x8xf32>
    %198 = vector.extract_strided_slice %178 {offsets = [3, 0, 0], sizes = [1, 8, 8], strides = [1, 1, 1]} : vector<4x8x8xf32> to vector<1x8x8xf32>
    %199 = vector.shape_cast %198 : vector<1x8x8xf32> to vector<8x8xf32>
    %200 = tpu.concatenate %193, %195, %197, %199 in 1 : vector<8x8xf32>, vector<8x8xf32>, vector<8x8xf32>, vector<8x8xf32> -> vector<8x32xf32>
    %201 = arith.truncf %200 : vector<8x32xf32> to vector<8x32xbf16>
    %c3 = arith.constant 3 : index
    %c0_66 = arith.constant 0 : index
    %c0_67 = arith.constant 0 : index
    %202 = vector.load %arg12[%c3, %c0_66, %c0_67] : memref<4x32x32xbf16, #tpu.memory_space<vmem>>, vector<1x32x32xbf16>
    %203 = vector.shape_cast %202 : vector<1x32x32xbf16> to vector<32x32xbf16>
    %cst_68 = arith.constant dense<0.000000e+00> : vector<8x32xf32>
    %204 = tpu.matmul %201, %203, %cst_68 {dimension_numbers = #tpu.dot_dimension_numbers<[1], [0], [0], [1], [0, 0, 1, 1], [], []>} : vector<8x32xbf16>, vector<32x32xbf16>, vector<8x32xf32> -> vector<8x32xf32>
    %c3_69 = arith.constant 3 : index
    %c0_70 = arith.constant 0 : index
    %205 = vector.load %arg13[%c3_69, %c0_70] : memref<4x32xf32, #tpu.memory_space<vmem>>, vector<1x32xf32>
    %206 = vector.broadcast %205 : vector<1x32xf32> to vector<8x32xf32>
    %207 = arith.addf %204, %206 : vector<8x32xf32>
    %208 = arith.addf %106, %207 : vector<8x32xf32>
    %c1_71 = arith.constant 1 : index
    %c0_72 = arith.constant 0 : index
    %209 = vector.load %arg18[%c1_71, %c0_72] : memref<3x32xf32, #tpu.memory_space<vmem>>, vector<1x32xf32>
    %c1_73 = arith.constant 1 : index
    %c0_74 = arith.constant 0 : index
    %210 = vector.load %arg19[%c1_73, %c0_74] : memref<3x32xf32, #tpu.memory_space<vmem>>, vector<1x32xf32>
    %cst_75 = arith.constant dense<0.000000e+00> : vector<8xf32>
    %211 = vector.multi_reduction <add>, %208, %cst_75 [1] : vector<8x32xf32> to vector<8xf32>
    %212 = vector.shape_cast %211 : vector<8xf32> to vector<8x1xf32>
    %cst_76 = arith.constant 3.200000e+01 : f32
    %213 = vector.broadcast %cst_76 : f32 to vector<8x1xf32>
    %214 = arith.divf %212, %213 : vector<8x1xf32>
    %215 = vector.broadcast %214 : vector<8x1xf32> to vector<8x32xf32>
    %216 = arith.subf %208, %215 : vector<8x32xf32>
    %217 = arith.mulf %216, %216 : vector<8x32xf32>
    %cst_77 = arith.constant dense<0.000000e+00> : vector<8xf32>
    %218 = vector.multi_reduction <add>, %217, %cst_77 [1] : vector<8x32xf32> to vector<8xf32>
    %219 = vector.shape_cast %218 : vector<8xf32> to vector<8x1xf32>
    %cst_78 = arith.constant 3.200000e+01 : f32
    %220 = vector.broadcast %cst_78 : f32 to vector<8x1xf32>
    %221 = arith.divf %219, %220 : vector<8x1xf32>
    %cst_79 = arith.constant 9.99999974E-6 : f32
    %222 = vector.broadcast %cst_79 : f32 to vector<8x1xf32>
    %223 = arith.addf %221, %222 : vector<8x1xf32>
    %224 = math.rsqrt %223 : vector<8x1xf32>
    %225 = vector.broadcast %224 : vector<8x1xf32> to vector<8x32xf32>
    %226 = arith.mulf %216, %225 : vector<8x32xf32>
    %227 = vector.broadcast %209 : vector<1x32xf32> to vector<8x32xf32>
    %228 = arith.mulf %226, %227 : vector<8x32xf32>
    %229 = vector.broadcast %210 : vector<1x32xf32> to vector<8x32xf32>
    %230 = arith.addf %228, %229 : vector<8x32xf32>
    %231 = arith.truncf %230 : vector<8x32xf32> to vector<8x32xbf16>
    %c0_80 = arith.constant 0 : index
    %c0_81 = arith.constant 0 : index
    %232 = vector.load %arg14[%c0_80, %c0_81] : memref<32x64xbf16, #tpu.memory_space<vmem>>, vector<32x64xbf16>
    %cst_82 = arith.constant dense<0.000000e+00> : vector<8x64xf32>
    %233 = tpu.matmul %231, %232, %cst_82 {dimension_numbers = #tpu.dot_dimension_numbers<[1], [0], [0], [1], [0, 0, 1, 1], [], []>} : vector<8x32xbf16>, vector<32x64xbf16>, vector<8x64xf32> -> vector<8x64xf32>
    %c0_83 = arith.constant 0 : index
    %c0_84 = arith.constant 0 : index
    %234 = vector.load %arg15[%c0_83, %c0_84] : memref<1x64xf32, #tpu.memory_space<vmem>>, vector<1x64xf32>
    %235 = vector.broadcast %234 : vector<1x64xf32> to vector<8x64xf32>
    %236 = arith.addf %233, %235 : vector<8x64xf32>
    %cst_85 = arith.constant 0.000000e+00 : f32
    %237 = vector.broadcast %cst_85 : f32 to vector<8x64xf32>
    %238 = arith.maximumf %236, %237 : vector<8x64xf32>
    %239 = arith.truncf %238 : vector<8x64xf32> to vector<8x64xbf16>
    %c0_86 = arith.constant 0 : index
    %c0_87 = arith.constant 0 : index
    %240 = vector.load %arg16[%c0_86, %c0_87] : memref<64x32xbf16, #tpu.memory_space<vmem>>, vector<64x32xbf16>
    %cst_88 = arith.constant dense<0.000000e+00> : vector<8x32xf32>
    %241 = tpu.matmul %239, %240, %cst_88 {dimension_numbers = #tpu.dot_dimension_numbers<[1], [0], [0], [1], [0, 0, 1, 1], [], []>} : vector<8x64xbf16>, vector<64x32xbf16>, vector<8x32xf32> -> vector<8x32xf32>
    %c0_89 = arith.constant 0 : index
    %c0_90 = arith.constant 0 : index
    %242 = vector.load %arg17[%c0_89, %c0_90] : memref<1x32xf32, #tpu.memory_space<vmem>>, vector<1x32xf32>
    %243 = vector.broadcast %242 : vector<1x32xf32> to vector<8x32xf32>
    %244 = arith.addf %241, %243 : vector<8x32xf32>
    %245 = arith.addf %230, %244 : vector<8x32xf32>
    %c2_91 = arith.constant 2 : index
    %c0_92 = arith.constant 0 : index
    %246 = vector.load %arg18[%c2_91, %c0_92] : memref<3x32xf32, #tpu.memory_space<vmem>>, vector<1x32xf32>
    %c2_93 = arith.constant 2 : index
    %c0_94 = arith.constant 0 : index
    %247 = vector.load %arg19[%c2_93, %c0_94] : memref<3x32xf32, #tpu.memory_space<vmem>>, vector<1x32xf32>
    %cst_95 = arith.constant dense<0.000000e+00> : vector<8xf32>
    %248 = vector.multi_reduction <add>, %245, %cst_95 [1] : vector<8x32xf32> to vector<8xf32>
    %249 = vector.shape_cast %248 : vector<8xf32> to vector<8x1xf32>
    %cst_96 = arith.constant 3.200000e+01 : f32
    %250 = vector.broadcast %cst_96 : f32 to vector<8x1xf32>
    %251 = arith.divf %249, %250 : vector<8x1xf32>
    %252 = vector.broadcast %251 : vector<8x1xf32> to vector<8x32xf32>
    %253 = arith.subf %245, %252 : vector<8x32xf32>
    %254 = arith.mulf %253, %253 : vector<8x32xf32>
    %cst_97 = arith.constant dense<0.000000e+00> : vector<8xf32>
    %255 = vector.multi_reduction <add>, %254, %cst_97 [1] : vector<8x32xf32> to vector<8xf32>
    %256 = vector.shape_cast %255 : vector<8xf32> to vector<8x1xf32>
    %cst_98 = arith.constant 3.200000e+01 : f32
    %257 = vector.broadcast %cst_98 : f32 to vector<8x1xf32>
    %258 = arith.divf %256, %257 : vector<8x1xf32>
    %cst_99 = arith.constant 9.99999974E-6 : f32
    %259 = vector.broadcast %cst_99 : f32 to vector<8x1xf32>
    %260 = arith.addf %258, %259 : vector<8x1xf32>
    %261 = math.rsqrt %260 : vector<8x1xf32>
    %262 = vector.broadcast %261 : vector<8x1xf32> to vector<8x32xf32>
    %263 = arith.mulf %253, %262 : vector<8x32xf32>
    %264 = vector.broadcast %246 : vector<1x32xf32> to vector<8x32xf32>
    %265 = arith.mulf %263, %264 : vector<8x32xf32>
    %266 = vector.broadcast %247 : vector<1x32xf32> to vector<8x32xf32>
    %267 = arith.addf %265, %266 : vector<8x32xf32>
    %c0_100 = arith.constant 0 : index
    %c0_101 = arith.constant 0 : index
    %c0_102 = arith.constant 0 : index
    %268 = vector.load %arg20[%c0_100, %c0_101, %c0_102] : memref<1x8x32xf32, #tpu.memory_space<vmem>>, vector<1x8x32xf32>
    %269 = vector.shape_cast %268 : vector<1x8x32xf32> to vector<8x32xf32>
    %270 = vector.shape_cast %267 : vector<8x32xf32> to vector<1x8x32xf32>
    tpu.vector_store %arg20[%c0_100, %c0_101, %c0_102], %270 {strides = array<i32>} : memref<1x8x32xf32, #tpu.memory_space<vmem>>, vector<1x8x32xf32>,
    %c0_103 = arith.constant 0 : index
    %c0_104 = arith.constant 0 : index
    %c0_105 = arith.constant 0 : index
    %271 = vector.load %arg21[%c0_103, %c0_104, %c0_105] : memref<1x8x128xf32, #tpu.memory_space<vmem>>, vector<1x8x128xf32>
    %272 = vector.shape_cast %271 : vector<1x8x128xf32> to vector<8x128xf32>
    %273 = vector.shape_cast %191 : vector<8x128xf32> to vector<1x8x128xf32>
    tpu.vector_store %arg21[%c0_103, %c0_104, %c0_105], %273 {strides = array<i32>} : memref<1x8x128xf32, #tpu.memory_space<vmem>>, vector<1x8x128xf32>,
    return
  }
  func.func @transform_0(%arg0: i32) -> (i32, i32, i32) {
    %c0_i32 = arith.constant 0 : i32
    %c0_i32_0 = arith.constant 0 : i32
    %c0_i32_1 = arith.constant 0 : i32
    return %arg0, %c0_i32, %c0_i32_0 : i32, i32, i32
  }
  func.func @transform_1(%arg0: i32) -> (i32, i32, i32) {
    %c0_i32 = arith.constant 0 : i32
    %c0_i32_0 = arith.constant 0 : i32
    %c0_i32_1 = arith.constant 0 : i32
    return %arg0, %c0_i32, %c0_i32_0 : i32, i32, i32
  }
  func.func @transform_2(%arg0: i32) -> (i32, i32, i32) {
    %c0_i32 = arith.constant 0 : i32
    %c0_i32_0 = arith.constant 0 : i32
    %c0_i32_1 = arith.constant 0 : i32
    return %arg0, %c0_i32, %c0_i32_0 : i32, i32, i32
  }
  func.func @transform_3(%arg0: i32) -> (i32, i32, i32) {
    %c0_i32 = arith.constant 0 : i32
    %c0_i32_0 = arith.constant 0 : i32
    %c0_i32_1 = arith.constant 0 : i32
    return %arg0, %c0_i32, %c0_i32_0 : i32, i32, i32
  }
  func.func @transform_4(%arg0: i32) -> (i32, i32, i32) {
    %c0_i32 = arith.constant 0 : i32
    %c0_i32_0 = arith.constant 0 : i32
    %c0_i32_1 = arith.constant 0 : i32
    return %arg0, %c0_i32, %c0_i32_0 : i32, i32, i32
  }
  func.func @transform_5(%arg0: i32) -> (i32, i32) {
    %c0_i32 = arith.constant 0 : i32
    %c0_i32_0 = arith.constant 0 : i32
    %c0_i32_1 = arith.constant 0 : i32
    return %c0_i32, %c0_i32_0 : i32, i32
  }
  func.func @transform_6(%arg0: i32) -> (i32, i32) {
    %c0_i32 = arith.constant 0 : i32
    %c0_i32_0 = arith.constant 0 : i32
    %c0_i32_1 = arith.constant 0 : i32
    return %c0_i32, %c0_i32_0 : i32, i32
  }
  func.func @transform_7(%arg0: i32) -> (i32, i32) {
    %c0_i32 = arith.constant 0 : i32
    %c0_i32_0 = arith.constant 0 : i32
    %c0_i32_1 = arith.constant 0 : i32
    return %c0_i32, %c0_i32_0 : i32, i32
  }
  func.func @transform_8(%arg0: i32) -> (i32, i32) {
    %c0_i32 = arith.constant 0 : i32
    %c0_i32_0 = arith.constant 0 : i32
    %c0_i32_1 = arith.constant 0 : i32
    return %c0_i32, %c0_i32_0 : i32, i32
  }
  func.func @transform_9(%arg0: i32) -> (i32, i32) {
    %c0_i32 = arith.constant 0 : i32
    %c0_i32_0 = arith.constant 0 : i32
    %c0_i32_1 = arith.constant 0 : i32
    return %c0_i32, %c0_i32_0 : i32, i32
  }
  func.func @transform_10(%arg0: i32) -> (i32, i32) {
    %c0_i32 = arith.constant 0 : i32
    %c0_i32_0 = arith.constant 0 : i32
    %c0_i32_1 = arith.constant 0 : i32
    return %c0_i32, %c0_i32_0 : i32, i32
  }
  func.func @transform_11(%arg0: i32) -> (i32, i32, i32) {
    %c0_i32 = arith.constant 0 : i32
    %c0_i32_0 = arith.constant 0 : i32
    %c0_i32_1 = arith.constant 0 : i32
    %c0_i32_2 = arith.constant 0 : i32
    return %c0_i32, %c0_i32_0, %c0_i32_1 : i32, i32, i32
  }
  func.func @transform_12(%arg0: i32) -> (i32, i32) {
    %c0_i32 = arith.constant 0 : i32
    %c0_i32_0 = arith.constant 0 : i32
    %c0_i32_1 = arith.constant 0 : i32
    return %c0_i32, %c0_i32_0 : i32, i32
  }
  func.func @transform_13(%arg0: i32) -> (i32, i32) {
    %c0_i32 = arith.constant 0 : i32
    %c0_i32_0 = arith.constant 0 : i32
    %c0_i32_1 = arith.constant 0 : i32
    return %c0_i32, %c0_i32_0 : i32, i32
  }
  func.func @transform_14(%arg0: i32) -> (i32, i32) {
    %c0_i32 = arith.constant 0 : i32
    %c0_i32_0 = arith.constant 0 : i32
    %c0_i32_1 = arith.constant 0 : i32
    return %c0_i32, %c0_i32_0 : i32, i32
  }
  func.func @transform_15(%arg0: i32) -> (i32, i32) {
    %c0_i32 = arith.constant 0 : i32
    %c0_i32_0 = arith.constant 0 : i32
    %c0_i32_1 = arith.constant 0 : i32
    return %c0_i32, %c0_i32_0 : i32, i32
  }
  func.func @transform_16(%arg0: i32) -> (i32, i32) {
    %c0_i32 = arith.constant 0 : i32
    %c0_i32_0 = arith.constant 0 : i32
    %c0_i32_1 = arith.constant 0 : i32
    return %c0_i32, %c0_i32_0 : i32, i32
  }
  func.func @transform_17(%arg0: i32) -> (i32, i32) {
    %c0_i32 = arith.constant 0 : i32
    %c0_i32_0 = arith.constant 0 : i32
    %c0_i32_1 = arith.constant 0 : i32
    return %c0_i32, %c0_i32_0 : i32, i32
  }
  func.func @transform_18(%arg0: i32) -> (i32, i32) {
    %c0_i32 = arith.constant 0 : i32
    %c0_i32_0 = arith.constant 0 : i32
    %c0_i32_1 = arith.constant 0 : i32
    return %c0_i32, %c0_i32_0 : i32, i32
  }
  func.func @transform_19(%arg0: i32) -> (i32, i32, i32) {
    %c0_i32 = arith.constant 0 : i32
    %c0_i32_0 = arith.constant 0 : i32
    %c0_i32_1 = arith.constant 0 : i32
    return %arg0, %c0_i32, %c0_i32_0 : i32, i32, i32
  }
  func.func @transform_20(%arg0: i32) -> (i32, i32, i32) {
    %c0_i32 = arith.constant 0 : i32
    %c0_i32_0 = arith.constant 0 : i32
    %c0_i32_1 = arith.constant 0 : i32
    return %arg0, %c0_i32, %c0_i32_0 : i32, i32, i32
  }
}

</mosaic_0001>

<bundles_post_ra>
// kernel: decoder_layer_forward.1
= control target key start
LH: loop header
LB: loop body
LE: loop exit
PB: predicated region body
PF: predicated region fallthrough
CT: control target
= control target key end

     0   :  { %s5087_s0 = inlined_call_operand.vmem [shape: f32[2,8,32], index: 0, kind: input, shape index: {}]   ;;  %s5088_s1 = inlined_call_operand.vmem [shape: f32[2,128,32], index: 1, kind: input, shape index: {}]   ;;  %s5089_s2 = inlined_call_operand.vmem [shape: f32[2,128,32], index: 2, kind: input, shape index: {}]   ;;  %s5090_s3 = inlined_call_operand.vmem [shape: f32[2,8,32], index: 3, kind: input, shape index: {}]   ;;  %s5091_s4 = inlined_call_operand.vmem [shape: f32[2,1,128], index: 4, kind: input, shape index: {}]   ;;  %s5092_s5 = inlined_call_operand.vmem [shape: bf16[32,64], index: 5, kind: input, shape index: {}]   ;;  %s5093_s6 = inlined_call_operand.vmem [shape: f32[1,64], index: 6, kind: input, shape index: {}]   ;;  %s5094_s7 = inlined_call_operand.vmem [shape: bf16[32,32], index: 7, kind: input, shape index: {}]   ;;  %s5095_s8 = inlined_call_operand.vmem [shape: f32[1,32], index: 8, kind: input, shape index: {}]   ;;  %s5096_s9 = inlined_call_operand.vmem [shape: bf16[32,32], index: 9, kind: input, shape index: {}]   ;;  %s5097_s10 = inlined_call_operand.vmem [shape: f32[1,32], index: 10, kind: input, shape index: {}]   ;;  %s5098_s11 = inlined_call_operand.vmem [shape: bf16[4,32,32], index: 11, kind: input, shape index: {}]   ;;  %s5099_s12 = inlined_call_operand.vmem [shape: f32[4,32], index: 12, kind: input, shape index: {}]   ;;  %s5100_s13 = inlined_call_operand.vmem [shape: bf16[32,64], index: 13, kind: input, shape index: {}]   ;;  %s5101_s14 = inlined_call_operand.vmem [shape: f32[1,64], index: 14, kind: input, shape index: {}]   ;;  %s5102_s15 = inlined_call_operand.vmem [shape: bf16[64,32], index: 15, kind: input, shape index: {}]   ;;  %s5103_s16 = inlined_call_operand.vmem [shape: f32[1,32], index: 16, kind: input, shape index: {}]   ;;  %s5104_s17 = inlined_call_operand.vmem [shape: f32[3,32], index: 17, kind: input, shape index: {}]   ;;  %s5105_s18 = inlined_call_operand.vmem [shape: f32[3,32], index: 18, kind: input, shape index: {}]   ;;  %s5106_s19 = inlined_call_operand.vmem [shape: f32[2,8,32], index: 19, kind: output, shape index: {0}]   ;;  %s5107_s20 = inlined_call_operand.hbm [shape: f32[2,8,128], index: 20, kind: output, shape index: {1}]  }
   0x1   :  { %5120 = sst [smem:[#allocation8_spill]] %s5087_s0 }
   0x2   :  { %5121 = sst [smem:[#allocation9_spill]] %s5088_s1 }
   0x3   :  { %5122 = sst [smem:[#allocation10_spill]] %s5089_s2 }
   0x4   :  { %5123 = sst [smem:[#allocation11_spill]] %s5090_s3 }
   0x5   :  { %5124 = sst [smem:[#allocation12_spill]] %s5091_s4 }
   0x6   :  { %5125 = sst [smem:[#allocation13_spill]] %s5092_s5 }
   0x7   :  { %5126 = sst [smem:[#allocation14_spill]] %s5093_s6 }
   0x8   :  { %5127 = sst [smem:[#allocation15_spill]] %s5094_s7 }
   0x9   :  { %5128 = sst [smem:[#allocation16_spill]] %s5095_s8 }
   0xa   :  { %5129 = sst [smem:[#allocation17_spill]] %s5096_s9 }
   0xb   :  { %26 = vsyncpa [#allocation3], 0 }
   0xc   :  { %28 = vsyncpa [#allocation3 + $0x1], 0  ;;  %s4229_s1 = smov 0   ;;  %s4231_s22 = smov 0  }
   0xd   :  { %s4233_s23 = smov 0   ;;  %s4235_s24 = smov 0  }
   0xe LB: > { %5130 = sst [smem:[#allocation5_spill]] %s4108_s23  ;;  %s4250_s2 = sadd.s32 4294967295, %s4112_s24   ;;  %s4112_s24 = sphi %s4235_s24, %s5151_s24   ;;  %s4108_s23 = sphi %s4233_s23, %s5153_s23   ;;  %s4104_s22 = sphi %s4231_s22, %s5155_s22   ;;  %s4100_s1 = sphi %s4229_s1, %s5154_s1  }
   0xf   : > { %s3164_s25 = sadd.s32 4294967294, %s4112_s24   ;;  %s4254_s3 = sadd.s32 1, %s4112_s24  }
  0x10   : > { %5131 = sst [smem:[#allocation6_spill]] %s4254_s3  ;;  %s491_s26 = sadd.s32 1, %s4108_s23 }
  0x11   : > { %s488_s27 = ssub.s32 %s4112_s24, %s4254_s3  ;;  %p501_p0 = scmp.ne.s32.totalorder %s4108_s23, %s4104_s22 }
  0x12   : > { %p489_p1 = scmp.eq.s32.totalorder %s488_s27, 0  ;;  %p502_p2 = scmp.eq.s32.totalorder %s4250_s2, 1 }
  0x13   : > { %p507_p3 = scmp.ne.s32.totalorder %s4104_s22, %s4100_s1  ;;  %p508_p4 = scmp.eq.s32.totalorder %s3164_s25, 1 }
  0x14   : > { %s4265_s28 = scalar_select %p489_p1, %s4108_s23, %s491_s26  }
  0x15   : > { %p4267_p5 = por %p502_p2, %p501_p0  ;;  %p4271_p6 = por %p508_p4, %p507_p3 }
  0x16   : > { %5132 = sst [smem:[#allocation7_spill]] %s4265_s28  ;;  %p3167_p7 = scmp.ge.s32.totalorder %s4112_s24, 1 }
  0x17   : > { %p604_p8 = scmp.lt.s32.totalorder %s4112_s24, 3 }
  0x19   : > { %p605_p9 = pnand %p3167_p7, %p604_p8 }
  0x1a   : > { %s5135_s5 = sld [smem:[#allocation13_spill]] (!%p605_p9)  ;;  %v4114_v1 = vmov (!%p605_p9), 0.0   ;;  %vm4115_vm0 = vmmov (!%p605_p9), 0   ;;  %p682_p10 = scmp.lt.s32.totalorder (!%p605_p9), %s4250_s2, 1  ;;  %vm767_vm1 = vcmask (!%p605_p9), 261120   ;;  %vm909_vm2 = vcmask (!%p605_p9), 64512  }
  0x1b   : > { %608 = sbr.rel (%p605_p9) target bundleno = 4279 (0x10b7), region = 96  ;;  %3396 = vmatprep.subr.bf16.mxu1 (!%p605_p9), %v4114_v1  ;;  %3412 = vmatprep.subr.bf16.mxu0 (!%p605_p9), %v4114_v1  ;;  %s5136_s21 = sld [smem:[#allocation8_spill]] (!%p605_p9)  ;;  %vm1158_vm3 = vcmask (!%p605_p9), 1043456   ;;  %vm1357_vm4 = vcmask (!%p605_p9), 130048   ;;  %vm1359_vm5 = vcmask (!%p605_p9), 195584   ;;  %vm2943_vm6 = vcmask (!%p605_p9), 523264  }
  0x1c   : > { %3400 = vmatprep.mubr.msk.bf16.mxu1 (!%p605_p9), %vm4115_vm0, %v4114_v1  ;;  %3414 = vmatprep.mubr.msk.bf16.mxu0 (!%p605_p9), %vm4115_vm0, %v4114_v1  ;;  %s5137_s23 = sld [smem:[#allocation11_spill]] (!%p605_p9)  ;;  %s5138_s6 = sld [smem:[#allocation14_spill]] (!%p605_p9) }
  0x1d   : > { %s5139_s7 = sld [smem:[#allocation15_spill]] (!%p605_p9)  ;;  %s5118_s28 = smov (!%p605_p9), 120  }
  0x1e   : > { %s5114_s30 = smov (!%p605_p9), 112   ;;  %s4119_s0 = smov (!%p605_p9), 96  }
  0x1f   : > { %s5140_s8 = sld [smem:[#allocation16_spill]] (!%p605_p9)  ;;  %s5141_s9 = sld [smem:[#allocation17_spill]] (!%p605_p9) }
  0x20   : > { %v3992_v0 = vld [vmem:[%s5135_s5] sm:$0xff] (!%p605_p9)   ;;  %v3993_v2 = vld [vmem:[%s5135_s5 + $0x8] sm:$0xff] (!%p605_p9)   ;;  %s5144_s5 = smov (!%p605_p9), 120  }
  0x21   : > { %3397 = vmatpush3.bf16.msra.mxu1 (!%p605_p9), %v3992_v0 }
  0x22   : > { %3398 = vmatprep.subr.bf16.mxu1 %v4114_v1  ;;  %s4292_s26 = scalar_select %p682_p10, %s4250_s2, 1  ;;  %v3176_v7 = vld [vmem:[%s5138_s6] ss:$0 sm:$0xff] }
  0x23   : > { %v3994_v12 = vld [vmem:[%s5139_s7] sm:$0xff]   ;;  %v3995_v14 = vld [vmem:[%s5139_s7 + $0x8] sm:$0xff]  }
  0x24   : > { %s4295_s27 = sshll.u32 %s4292_s26, 3 }
  0x25   : > { %3399 = vmatpush3.bf16.msra.mxu1 %v3993_v2  ;;  %s685_s25 = scalar_lea.vmem %s5136_s21, %s4295_s27  ;;  %s699_s3 = scalar_lea.vmem %s5137_s23, %s4295_s27  ;;  %v3180_v30 = vld [vmem:[%s5140_s8] ss:$0 sm:$0xff] }
  0x26   : > { %3404 = vmatprep.subr.bf16.mxu1 %v4114_v1  ;;  %v4306_v3 = vld [vmem:[%s685_s25] sm:$0xff]  ;;  %s5113_s23 = smov 8   ;;  %s5112_s21 = smov 16  }
  0x27   : > { %v4308_v4 = vld [vmem:[%s699_s3] sm:$0xff]  ;;  %s5116_s3 = smov 104   ;;  %v811_v16 = vpack.c.bf16 %v4306_v3, %v4306_v3  ;;  %s5111_s25 = smov 24  }
  0x28   : > { %v742_v5 = vadd.f32 %v4308_v4, %v4306_v3  ;;  %s5150_s8 = smov 24  }
  0x2a   : > { %v743_v6 = vpack.c.bf16 %v742_v5, %v742_v5 }
  0x2c   : > { %3401 = vmatmul.mubr.msk.bf16.vlgmr.msra.gmra.mrb[0].mxu1 %vm767_vm1, %v743_v6 }
  0x2d   : > { %3408 = vmatprep.mubr.msk.bf16.mxu1 %vm4115_vm0, %v4114_v1  ;;  %3405 = vmatpush3.bf16.msra.mxu1 %v3994_v12 }
  0x2e   : > { %3406 = vmatprep.subr.bf16.mxu1 %v4114_v1 }
  0x31   : > { %3407 = vmatpush3.bf16.msra.mxu1 %v3995_v14 }
  0x32   : > { %3418 = vmatprep.subr.bf16.mxu1 %v4114_v1 }
  0x34   : > { %3409 = vmatmul.mubr.msk.bf16.vlgmr.msra.gmra.mrb[4].mxu1 %vm767_vm1, %v811_v16 }
  0x35   : > { %3420 = vmatprep.mubr.msk.bf16.mxu1 %vm4115_vm0, %v4114_v1 }
  0xff   : > { %v805_v8 = vpop.f32.mrb[0].mxu1 }
 0x100   : > { %v806_v9 = vadd.f32 %v3176_v7, %v805_v8  ;;  %v3402_v10 = vpop.f32.mrb[1].mxu1 }
 0x101   : > { %v808_v11 = vpop.f32.mrb[2].mxu1 }
 0x102   : > { %885 = vrot.lane.b32.xlu1 %v806_v9, %s5116_s3  ;;  %879 = vrot.lane.b32.xlu0 %v806_v9, %s5118_s28  ;;  %v3403_v13 = vpop.f32.mrb[3].mxu1  ;;  %v888_v15 = vpack.c.bf16 %v806_v9, %v806_v9 }
 0x106   : > { %882 = vrot.lane.b32.xlu0 %v806_v9, %s5114_s30  ;;  %907 = vrot.lane.b32.xlu1 %v888_v15, %s4119_s0 }
 0x107   : > { %v872_v25 = vpop.f32.mrb[4].mxu1 }
 0x108   : > { %v3410_v26 = vpop.f32.mrb[5].mxu1  ;;  %v873_v32 = vadd.f32 %v3180_v30, %v872_v25 }
 0x109   : > { %v875_v27 = vpop.f32.mrb[6].mxu1 }
 0x10a   : > { %v3411_v28 = vpop.f32.mrb[7].mxu1  ;;  %v902_v36 = vpack.c.bf16 %v873_v32, %v873_v32 }
 0x10c   : > { %v1160_v38 = vsel %vm1158_vm3, %v902_v36, 0 }
 0x174   : > { %v886_v17 = vpop.permute.xlu1 %885  ;;  %v880_v18 = vpop.permute.xlu0 %879 }
 0x175   : > { %v889_v19 = vpack.c.bf16 %v880_v18, %v880_v18  ;;  %v891_v22 = vpack.c.bf16 %v886_v17, %v886_v17 }
 0x177   : > { %957 = vrot.lane.b32.xlu0 %v889_v19, %s4119_s0 }
 0x178   : > { %v883_v20 = vpop.permute.xlu0 %882  ;;  %v908_v21 = vpop.permute.xlu1 %907 }
 0x179   : > { %v890_v23 = vpack.c.bf16 %v883_v20, %v883_v20  ;;  %v914_v24 = vsel %vm909_vm2, %v908_v21, 0 }
 0x17a   : > { %3413 = vmatpush3.bf16.xpose.msra.mxu0 %v914_v24 }
 0x17b   : > { %1055 = vrot.lane.b32.xlu0 %v891_v22, %s4119_s0  ;;  %1006 = vrot.lane.b32.xlu1 %v890_v23, %s4119_s0  ;;  %s3260_s0 = sshll.u32 %s4250_s2, 7 }
 0x17c   : > { %3424 = vmatprep.subr.bf16.mxu0 %v4114_v1 }
 0x181   : > { %3415 = vmatmul.mubr.msk.bf16.vlgmr.msra.gmra.mrb[0].mxu0 %vm909_vm2, %v888_v15 }
 0x182   : > { %3426 = vmatprep.mubr.msk.bf16.mxu0 %vm4115_vm0, %v4114_v1 }
 0x1e9   : > { %v958_v29 = vpop.permute.xlu0 %957 }
 0x1ea   : > { %v963_v31 = vsel %vm909_vm2, %v958_v29, 0 }
 0x1eb   : > { %3419 = vmatpush3.bf16.xpose.msra.mxu1 %v963_v31 }
 0x1ec   : > { %3430 = vmatprep.subr.bf16.mxu1 %v4114_v1 }
 0x1ed   : > { %v1007_v33 = vpop.permute.xlu1 %1006  ;;  %v1056_v35 = vpop.permute.xlu0 %1055 }
 0x1ee   : > { %v1012_v34 = vsel %vm909_vm2, %v1007_v33, 0  ;;  %v1061_v37 = vsel %vm909_vm2, %v1056_v35, 0 }
 0x1ef   : > { %3425 = vmatpush3.bf16.xpose.msra.mxu0 %v1012_v34 }
 0x1f0   : > { %3436 = vmatprep.subr.bf16.mxu0 %v4114_v1 }
 0x1f2   : > { %3421 = vmatmul.mubr.msk.bf16.vlgmr.msra.gmra.mrb[8].mxu1 %vm909_vm2, %v889_v19 }
 0x1f3   : > { %3431 = vmatpush3.bf16.xpose.msra.mxu1 %v1061_v37  ;;  %3432 = vmatprep.mubr.msk.bf16.mxu1 %vm4115_vm0, %v4114_v1 }
 0x1f4   : > { %3442 = vmatprep.subr.bf16.mxu1 %v4114_v1 }
 0x1f6   : > { %3427 = vmatmul.mubr.msk.bf16.vlgmr.msra.gmra.mrb[4].mxu0 %vm909_vm2, %v890_v23 }
 0x1f7   : > { %3437 = vmatpush3.bf16.msra.mxu0 %v1160_v38  ;;  %3438 = vmatprep.mubr.msk.bf16.mxu0 %vm4115_vm0, %v4114_v1 }
 0x1f8   : > { %3448 = vmatprep.subr.bf16.mxu0 %v4114_v1 }
 0x1fa   : > { %3433 = vmatmul.mubr.msk.bf16.vlgmr.msra.gmra.mrb[12].mxu1 %vm909_vm2, %v891_v22 }
 0x1fb   : > { %3444 = vmatprep.mubr.msk.bf16.mxu1 %vm4115_vm0, %v4114_v1 }
 0x254   : > { %v950_v39 = vpop.f32.mrb[0].mxu0 }
 0x255   : > { %v1103_v40 = vmul.f32 0.35355338, %v950_v39  ;;  %v3416_v41 = vpop.f32.mrb[1].mxu0 }
 0x256   : > { %v953_v42 = vpop.f32.mrb[2].mxu0  ;;  %v3996_v41 = vld [vmem:[%s5141_s9] sm:$0xff]  }
 0x257   : > { %v3417_v43 = vpop.f32.mrb[3].mxu0  ;;  %v1107_v44 = vsel %vm909_vm2, %v1103_v40, -inf }
 0x258   : > { %1108 = vmax.xlane.f32.xlu1 %v1107_v44  ;;  %v3997_v43 = vld [vmem:[%s5141_s9 + $0x8] sm:$0xff]  }
 0x269   : > { %896 = vrot.lane.b32.xlu1 %v873_v32, %s5114_s30  ;;  %s5142_s30 = sld [smem:[#allocation9_spill]] }
 0x2c5   : > { %v999_v45 = vpop.f32.mrb[8].mxu1 }
 0x2c6   : > { %v1104_v46 = vmul.f32 0.35355338, %v999_v45  ;;  %v3422_v47 = vpop.f32.mrb[9].mxu1 }
 0x2c7   : > { %v1002_v48 = vpop.f32.mrb[10].mxu1 }
 0x2c8   : > { %v3423_v49 = vpop.f32.mrb[11].mxu1  ;;  %v1110_v50 = vsel %vm909_vm2, %v1104_v46, -inf }
 0x2c9   : > { %v1048_v51 = vpop.f32.mrb[4].mxu0  ;;  %1111 = vmax.xlane.f32.xlu0 %v1110_v50 }
 0x2ca   : > { %v1105_v52 = vmul.f32 0.35355338, %v1048_v51  ;;  %v3428_v53 = vpop.f32.mrb[5].mxu0 }
 0x2cb   : > { %v1051_v54 = vpop.f32.mrb[6].mxu0 }
 0x2cc   : > { %v3429_v55 = vpop.f32.mrb[7].mxu0  ;;  %v1113_v56 = vsel %vm909_vm2, %v1105_v52, -inf }
 0x2cd   : > { %1114 = vmax.xlane.f32.xlu0 %v1113_v56  ;;  %v1097_v57 = vpop.f32.mrb[12].mxu1 }
 0x2ce   : > { %v1106_v58 = vmul.f32 0.35355338, %v1097_v57  ;;  %v3434_v59 = vpop.f32.mrb[13].mxu1 }
 0x2cf   : > { %v1100_v60 = vpop.f32.mrb[14].mxu1 }
 0x2d0   : > { %v3435_v61 = vpop.f32.mrb[15].mxu1  ;;  %v1116_v62 = vsel %vm909_vm2, %v1106_v58, -inf }
 0x2d1   : > { %1117 = vmax.xlane.f32.xlu1 %v1116_v62 }
 0x2e2   : > { %899 = vrot.lane.b32.xlu1 %v873_v32, %s5116_s3 }
 0x2e3   : > { %893 = vrot.lane.b32.xlu0 %v873_v32, %s5118_s28  ;;  %s5143_s28 = sld [smem:[#allocation10_spill]] }
 0x2e5   : > { %v1109_v63 = vpop.xlane.xlu1 %1108 }
 0x2e6   : > { %v1119_v0 = vsub.f32 %v1103_v40, %v1109_v63 }
 0x2e8   : > { %v1123_v2 = vmul.f32 1.442695, %v1119_v0 }
 0x2e9   : > { %v897_v5 = vpop.permute.xlu1 %896 }
 0x2ea   : > { %4012 = vpow2.f32 %v1123_v2  ;;  %v904_v6 = vpack.c.bf16 %v897_v5, %v897_v5 }
 0x2ec   : > { %v1252_v9 = vsel %vm1158_vm3, %v904_v6, 0 }
 0x2f4   : > { %v4013_v7 = vpop.eup %4012 }
 0x2f5   : > { %v1151_v8 = vpack.c.bf16 %v4013_v7, %v4013_v7  ;;  %v1131_v34 = vsel %vm909_vm2, %v4013_v7, 0.0 }
 0x2f7   : > { %3439 = vmatmul.mubr.msk.bf16.vlgmr.msra.gmra.mrb[8].mxu0 %vm909_vm2, %v1151_v8 }
 0x2f8   : > { %3449 = vmatpush3.bf16.msra.mxu0 %v1252_v9  ;;  %3450 = vmatprep.mubr.msk.bf16.mxu0 %vm4115_vm0, %v4114_v1 }
 0x2f9   : > { %3460 = vmatprep.subr.bf16.mxu0 %v4114_v1 }
 0x356   : > { %v1112_v10 = vpop.xlane.xlu0 %1111 }
 0x357   : > { %v1120_v11 = vsub.f32 %v1104_v46, %v1112_v10 }
 0x359   : > { %v1125_v12 = vmul.f32 1.442695, %v1120_v11  ;;  %v3192_v11 = vld [vmem:[%s5097_s10] ss:$0 sm:$0xff] }
 0x35a   : > { %v1115_v13 = vpop.xlane.xlu0 %1114 }
 0x35b   : > { %4014 = vpow2.f32 %v1125_v12  ;;  %v1121_v14 = vsub.f32 %v1105_v52, %v1115_v13 }
 0x35d   : > { %v1127_v15 = vmul.f32 1.442695, %v1121_v14 }
 0x35e   : > { %v894_v16 = vpop.permute.xlu0 %893  ;;  %v1118_v17 = vpop.xlane.xlu1 %1117 }
 0x35f   : > { %4016 = vpow2.f32 %v1127_v15  ;;  %v903_v18 = vpack.c.bf16 %v894_v16, %v894_v16  ;;  %v1122_v19 = vsub.f32 %v1106_v58, %v1118_v17 }
 0x361   : > { %v1206_v20 = vsel %vm1158_vm3, %v903_v18, 0  ;;  %v1129_v21 = vmul.f32 1.442695, %v1122_v19  ;;  %v3999_v19 = vld [vmem:[%s5098_s11 + $0x18] sm:$0xff]  }
 0x362   : > { %3443 = vmatpush3.bf16.msra.mxu1 %v1206_v20  ;;  %v900_v22 = vpop.permute.xlu1 %899 }
 0x363   : > { %4018 = vpow2.f32 %v1129_v21  ;;  %3454 = vmatprep.subr.bf16.mxu1 %v4114_v1  ;;  %v905_v23 = vpack.c.bf16 %v900_v22, %v900_v22 }
 0x365   : > { %v4015_v24 = vpop.eup %4014  ;;  %v1298_v27 = vsel %vm1158_vm3, %v905_v23, 0 }
 0x366   : > { %v1134_v25 = vsel %vm909_vm2, %v4015_v24, 0.0  ;;  %v1152_v26 = vpack.c.bf16 %v4015_v24, %v4015_v24 }
 0x367   : > { %1135 = vadd.xlane.f32.xlu0 %v1134_v25 }
 0x368   : > { %3445 = vmatmul.mubr.msk.bf16.vlgmr.msra.gmra.mrb[16].mxu1 %vm909_vm2, %v1152_v26 }
 0x369   : > { %v4017_v28 = vpop.eup %4016  ;;  %3455 = vmatpush3.bf16.msra.mxu1 %v1298_v27  ;;  %3456 = vmatprep.mubr.msk.bf16.mxu1 %vm4115_vm0, %v4114_v1 }
 0x36a   : > { %v1137_v29 = vsel %vm909_vm2, %v4017_v28, 0.0  ;;  %v1153_v30 = vpack.c.bf16 %v4017_v28, %v4017_v28  ;;  %3468 = vmatprep.subr.bf16.mxu1 %v4114_v1 }
 0x36b   : > { %1138 = vadd.xlane.f32.xlu1 %v1137_v29 }
 0x36c   : > { %3451 = vmatmul.mubr.msk.bf16.vlgmr.msra.gmra.mrb[12].mxu0 %vm909_vm2, %v1153_v30 }
 0x36d   : > { %v4019_v31 = vpop.eup %4018  ;;  %3464 = vmatprep.mubr.msk.bf16.mxu0 %vm4115_vm0, %v4114_v1  ;;  %3461 = vmatpush3.bf16.msra.mxu0 %v3996_v41 }
 0x36e   : > { %v1140_v32 = vsel %vm909_vm2, %v4019_v31, 0.0  ;;  %v1154_v33 = vpack.c.bf16 %v4019_v31, %v4019_v31  ;;  %3462 = vmatprep.subr.bf16.mxu0 %v4114_v1 }
 0x36f   : > { %1141 = vadd.xlane.f32.xlu0 %v1140_v32 }
 0x370   : > { %3457 = vmatmul.mubr.msk.bf16.vlgmr.msra.gmra.mrb[20].mxu1 %vm909_vm2, %v1154_v33 }
 0x371   : > { %3472 = vmatprep.mubr.msk.bf16.mxu1 %vm4115_vm0, %v4114_v1  ;;  %3463 = vmatpush3.bf16.msra.mxu0 %v3997_v43 }
 0x373   : > { %1132 = vadd.xlane.f32.xlu0 %v1131_v34 }
 0x3ca   : > { %v1196_v35 = vpop.f32.mrb[8].mxu0 }
 0x3cb   : > { %v3440_v36 = vpop.f32.mrb[9].mxu0 }
 0x3cc   : > { %v1199_v37 = vpop.f32.mrb[10].mxu0 }
 0x3cd   : > { %v3441_v38 = vpop.f32.mrb[11].mxu0 }
 0x3f4   : > { %v1136_v39 = vpop.xlane.xlu0 %1135 }
 0x3f5   : > { %4020 = vrcp.f32 %v1136_v39 }
 0x3f8   : > { %v1139_v40 = vpop.xlane.xlu1 %1138 }
 0x3f9   : > { %4022 = vrcp.f32 %v1139_v40 }
 0x3fc   : > { %v1142_v42 = vpop.xlane.xlu0 %1141 }
 0x3fd   : > { %4024 = vrcp.f32 %v1142_v42 }
 0x3ff   : > { %v4021_v44 = vpop.eup %4020 }
 0x400   : > { %v1133_v62 = vpop.xlane.xlu0 %1132 }
 0x401   : > { %4026 = vrcp.f32 %v1133_v62 }
 0x403   : > { %v4023_v50 = vpop.eup %4022 }
 0x407   : > { %v4025_v56 = vpop.eup %4024 }
 0x40b   : > { %v4027_v63 = vpop.eup %4026 }
 0x40c   : > { %v1340_v2 = vmul.f32 %v4027_v63, %v1196_v35 }
 0x43b   : > { %v1242_v45 = vpop.f32.mrb[16].mxu1 }
 0x43c   : > { %v1341_v46 = vmul.f32 %v4021_v44, %v1242_v45  ;;  %v3446_v47 = vpop.f32.mrb[17].mxu1 }
 0x43d   : > { %v1245_v48 = vpop.f32.mrb[18].mxu1 }
 0x43e   : > { %1345 = vrot.lane.b32.xlu1 %v1341_v46, %s5113_s23  ;;  %v3447_v49 = vpop.f32.mrb[19].mxu1  ;;  %s5146_s23 = smov 112  }
 0x43f   : > { %v1288_v51 = vpop.f32.mrb[12].mxu0 }
 0x440   : > { %v1342_v52 = vmul.f32 %v4023_v50, %v1288_v51  ;;  %v3452_v53 = vpop.f32.mrb[13].mxu0 }
 0x441   : > { %v1291_v54 = vpop.f32.mrb[14].mxu0 }
 0x442   : > { %v3453_v55 = vpop.f32.mrb[15].mxu0  ;;  %1349 = vrot.lane.b32.xlu0 %v1342_v52, %s5112_s21  ;;  %s5148_s21 = smov 8  }
 0x443   : > { %v1334_v57 = vpop.f32.mrb[20].mxu1 }
 0x444   : > { %v1343_v58 = vmul.f32 %v4025_v56, %v1334_v57  ;;  %v3458_v59 = vpop.f32.mrb[21].mxu1 }
 0x445   : > { %v1337_v60 = vpop.f32.mrb[22].mxu1 }
 0x446   : > { %1353 = vrot.lane.b32.xlu1 %v1343_v58, %s5111_s25  ;;  %v3459_v61 = vpop.f32.mrb[23].mxu1  ;;  %s3263_s25 = sshll.u32 %s4292_s26, 7 }
 0x447   : > { %s4414_s3 = scalar_lea.vmem %s5142_s30, %s3263_s25  ;;  %s4419_s6 = scalar_lea.vmem %s5143_s28, %s3263_s25 }
 0x448   : > { %v4428_v20 = vld [vmem:[%s4414_s3] sm:$0xff]  ;;  %v4431_v21 = vld [vmem:[%s4414_s3 + $0x8] sm:$0xff]  ;;  %v4438_v26 = vld [vmem:[%s4414_s3 + $0x10] sm:$0xff]  ;;  %s5145_s30 = smov 104  }
 0x449   : > { %v726_v22 = vld [vmem:[%s4419_s6] sm:$0xff]  ;;  %v727_v23 = vld [vmem:[%s4419_s6 + $0x8] sm:$0xff]  ;;  %v4441_v27 = vld [vmem:[%s4414_s3 + $0x18] sm:$0xff] }
 0x44a   : > { %v1456_v24 = vadd.f32 %v726_v22, %v4428_v20  ;;  %v1457_v25 = vadd.f32 %v727_v23, %v4431_v21  ;;  %v728_v28 = vld [vmem:[%s4419_s6 + $0x10] sm:$0xff]  ;;  %v729_v29 = vld [vmem:[%s4419_s6 + $0x18] sm:$0xff]  ;;  %v4447_v31 = vld [vmem:[%s4414_s3 + $0x20] sm:$0xff] }
 0x44b   : > { %v1458_v30 = vadd.f32 %v728_v28, %v4438_v26  ;;  %v4450_v32 = vld [vmem:[%s4414_s3 + $0x28] sm:$0xff]  ;;  %v1459_v34 = vadd.f32 %v729_v29, %v4441_v27  ;;  %v730_v35 = vld [vmem:[%s4419_s6 + $0x20] sm:$0xff]  ;;  %v4459_v40 = vld [vmem:[%s4414_s3 + $0x30] sm:$0xff] }
 0x44c   : > { %v1537_v33 = vpack.c.bf16 %v1457_v25, %v1456_v24  ;;  %v731_v36 = vld [vmem:[%s4419_s6 + $0x28] sm:$0xff]  ;;  %v1460_v37 = vadd.f32 %v730_v35, %v4447_v31  ;;  %v4462_v41 = vld [vmem:[%s4414_s3 + $0x38] sm:$0xff]  ;;  %v732_v43 = vld [vmem:[%s4419_s6 + $0x30] sm:$0xff] }
 0x44d   : > { %v1461_v38 = vadd.f32 %v731_v36, %v4450_v32  ;;  %v1538_v39 = vpack.c.bf16 %v1459_v34, %v1458_v30  ;;  %v733_v44 = vld [vmem:[%s4419_s6 + $0x38] sm:$0xff]  ;;  %v4467_v45 = vld [vmem:[%s4414_s3 + $0x40] sm:$0xff]  ;;  %v4470_v46 = vld [vmem:[%s4414_s3 + $0x48] sm:$0xff]  ;;  %v1462_v49 = vadd.f32 %v732_v43, %v4459_v40 }
 0x44e   : > { %v734_v47 = vld [vmem:[%s4419_s6 + $0x40] sm:$0xff]  ;;  %v735_v48 = vld [vmem:[%s4419_s6 + $0x48] sm:$0xff]  ;;  %v1463_v50 = vadd.f32 %v733_v44, %v4462_v41  ;;  %v4482_v54 = vld [vmem:[%s4414_s3 + $0x50] sm:$0xff] }
 0x44f   : > { %v1539_v42 = vpack.c.bf16 %v1461_v38, %v1460_v37  ;;  %v1464_v51 = vadd.f32 %v734_v47, %v4467_v45  ;;  %v1465_v52 = vadd.f32 %v735_v48, %v4470_v46  ;;  %v4485_v55 = vld [vmem:[%s4414_s3 + $0x58] sm:$0xff]  ;;  %v736_v57 = vld [vmem:[%s4419_s6 + $0x50] sm:$0xff]  ;;  %v4490_v59 = vld [vmem:[%s4414_s3 + $0x60] sm:$0xff] }
 0x450   : > { %v1540_v53 = vpack.c.bf16 %v1463_v50, %v1462_v49  ;;  %v737_v58 = vld [vmem:[%s4419_s6 + $0x58] sm:$0xff]  ;;  %v4493_v60 = vld [vmem:[%s4414_s3 + $0x68] sm:$0xff]  ;;  %v738_v61 = vld [vmem:[%s4419_s6 + $0x60] sm:$0xff]  ;;  %v1466_v63 = vadd.f32 %v736_v57, %v4482_v54 }
 0x451   : > { %v1541_v56 = vpack.c.bf16 %v1465_v52, %v1464_v51  ;;  %v739_v62 = vld [vmem:[%s4419_s6 + $0x68] sm:$0xff]  ;;  %v4000_v22 = vld [vmem:[%s5098_s11] sm:$0xff]  }
 0x452   : > { %3469 = vmatpush3.bf16.msra.mxu1 %v4000_v22  ;;  %v4001_v23 = vld [vmem:[%s5098_s11 + $0x8] sm:$0xff]   ;;  %v3206_v24 = vld [vmem:[%s5099_s12 + $0x1] ss:$0 sm:$0xff] }
 0x453   : > { %3470 = vmatprep.subr.bf16.mxu1 %v4114_v1 }
 0x456   : > { %3471 = vmatpush3.bf16.msra.mxu1 %v4001_v23 }
 0x4b0   : > { %v1346_v0 = vpop.permute.xlu1 %1345 }
 0x4b1   : > { %v1356_v6 = vsel %vm909_vm2, %v1340_v2, %v1346_v0  ;;  %v1467_v0 = vadd.f32 %v737_v58, %v4485_v55  ;;  %v1468_v2 = vadd.f32 %v738_v61, %v4490_v59 }
 0x4b4   : > { %v1350_v5 = vpop.permute.xlu0 %1349 }
 0x4b5   : > { %v1358_v7 = vsel %vm1357_vm4, %v1356_v6, %v1350_v5  ;;  %v1469_v5 = vadd.f32 %v739_v62, %v4493_v60  ;;  %v1542_v6 = vpack.c.bf16 %v1467_v0, %v1466_v63 }
 0x4b8   : > { %v1354_v8 = vpop.permute.xlu1 %1353 }
 0x4b9   : > { %v1360_v9 = vsel %vm1359_vm5, %v1358_v7, %v1354_v8  ;;  %v4504_v7 = vld [vmem:[%s4414_s3 + $0x70] sm:$0xff]  ;;  %v1543_v8 = vpack.c.bf16 %v1469_v5, %v1468_v2 }
 0x4ba   : > { %v1361_v10 = vpack.c.bf16 %v1360_v9, %v1360_v9  ;;  %v4507_v9 = vld [vmem:[%s4414_s3 + $0x78] sm:$0xff]  ;;  %s5147_s3 = sld [smem:[#allocation12_spill]] }
 0x4bc   : > { %3465 = vmatmul.mubr.msk.bf16.vlgmr.msra.gmra.mrb[16].mxu0 %vm767_vm1, %v1361_v10  ;;  %v740_v10 = vld [vmem:[%s4419_s6 + $0x70] sm:$0xff] }
 0x4bd   : > { %3480 = vmatprep.mubr.msk.bf16.mxu0 %vm767_vm1, %v1537_v33 }
 0x4c0   : > { %s702_s28 = scalar_lea.vmem %s5147_s3, %s4292_s26  ;;  %s679_s26 = sand.u32 1, %s4104_s22  }
 0x4c1   : > { %s3020_s3 = scalar_lea.sflag [#allocation3], %s679_s26 }
 0x58f   : > { %v1422_v12 = vpop.f32.mrb[16].mxu0 }
 0x590   : > { %v1423_v13 = vadd.f32 %v3192_v11, %v1422_v12  ;;  %v3466_v14 = vpop.f32.mrb[17].mxu0  ;;  %v741_v11 = vld [vmem:[%s4419_s6 + $0x78] sm:$0xff]  ;;  %v1470_v12 = vadd.f32 %v740_v10, %v4504_v7 }
 0x591   : > { %v1425_v15 = vpop.f32.mrb[18].mxu0 }
 0x592   : > { %v3467_v16 = vpop.f32.mrb[19].mxu0  ;;  %v4406_v17 = vadd.f32 %v1423_v13, %v4306_v3  ;;  %v3998_v3 = vld [vmem:[%s5098_s11 + $0x10] sm:$0xff]   ;;  %v1471_v13 = vadd.f32 %v741_v11, %v4507_v9 }
 0x593   : > { %3476 = vmatprep.subr.bf16.mxu0 %v3998_v3 }
 0x594   : > { %v1431_v18 = vsel %vm767_vm1, %v4406_v17, 0.0  ;;  %3477 = vmatpush3.bf16.msra.mxu0 %v3998_v3  ;;  %v1544_v14 = vpack.c.bf16 %v1471_v13, %v1470_v12 }
 0x595   : > { %1432 = vadd.xlane.f32.xlu1 %v1431_v18  ;;  %3478 = vmatprep.subr.bf16.mxu0 %v3999_v19 }
 0x598   : > { %3479 = vmatpush3.bf16.msra.mxu0 %v3999_v19 }
 0x599   : > { %3516 = vmatprep.subr.bf16.mxu0 %v4114_v1 }
 0x59b   : > { %3481 = vmatmul.mubr.msk.bf16.vlgmr.msra.gmra.mrb[20].mxu0 %vm767_vm1, %v1538_v39 }
 0x59c   : > { %3484 = vmatprep.mubr.msk.bf16.mxu0 %vm767_vm1, %v1539_v42 }
 0x5a3   : > { %3485 = vmatmul.mubr.msk.bf16.gmra.mrb[24].mxu0 %vm767_vm1, %v1540_v53 }
 0x5a4   : > { %3488 = vmatprep.mubr.msk.bf16.mxu0 %vm767_vm1, %v1541_v56 }
 0x5ab   : > { %3489 = vmatmul.mubr.msk.bf16.gmra.mrb[28].mxu0 %vm767_vm1, %v1542_v6 }
 0x5ac   : > { %3492 = vmatprep.mubr.msk.bf16.mxu0 %vm767_vm1, %v1543_v8 }
 0x5b3   : > { %3493 = vmatmul.mubr.msk.bf16.gmra.mrb[32].mxu0 %vm767_vm1, %v1544_v14 }
 0x5b4   : > { %3532 = vmatprep.mubr.msk.bf16.mxu0 %vm4115_vm0, %v4114_v1 }
 0x622   : > { %v1433_v15 = vpop.xlane.xlu1 %1432 }
 0x623   : > { %v1435_v16 = vmul.f32 0.03125, %v1433_v15 }
 0x625   : > { %v4519_v18 = vsub.f32 %v4406_v17, %v1435_v16  ;;  %v4534_v17 = vld [vmem:[%s5098_s11 + $0x20] sm:$0xff]  }
 0x626   : > { %3496 = vmatprep.subr.bf16.mxu1 %v4534_v17 }
 0x627   : > { %v1437_v3 = vmul.f32 %v4519_v18, %v4519_v18 }
 0x629   : > { %v1438_v19 = vsel %vm767_vm1, %v1437_v3, 0.0 }
 0x62a   : > { %1439 = vadd.xlane.f32.xlu0 %v1438_v19 }
 0x66e   : > { %v3482_v25 = vpop.f32.mrb[20].mxu0 }
 0x66f   : > { %v1634_v28 = vadd.f32 %v3482_v25, %v3206_v24  ;;  %v1625_v29 = vpop.f32.mrb[21].mxu0 }
 0x670   : > { %v1626_v30 = vadd.f32 %v3206_v24, %v1625_v29  ;;  %v3483_v33 = vpop.f32.mrb[22].mxu0 }
 0x671   : > { %v1637_v34 = vadd.f32 %v3483_v33, %v3206_v24  ;;  %v1628_v35 = vpop.f32.mrb[23].mxu0 }
 0x672   : > { %v1629_v36 = vadd.f32 %v3206_v24, %v1628_v35 }
 0x673   : > { %v4540_v37 = vpack.i.bf16 %v1637_v34, %v1634_v28  ;;  %v2015_v50 = vpack.c.bf16 %v1637_v34, %v1634_v28 }
 0x674   : > { %v3752_v38 = vpack.i.bf16 %v1629_v36, %v1626_v30  ;;  %v2014_v39 = vpack.c.bf16 %v1629_v36, %v1626_v30 }
 0x675   : > { %3758 = vrot.lane.b32.xlu1 %v4540_v37, %s5144_s5  ;;  %v2245_v58 = vsel %vm909_vm2, %v2015_v50, 0  ;;  %v3196_v50 = vld [vmem:[%s5104_s17] ss:$0 sm:$0xff] }
 0x676   : > { %v3486_v42 = vpop.f32.mrb[24].mxu0  ;;  %3753 = vrot.lane.b32.xlu0 %v3752_v38, %s5144_s5  ;;  %v2242_v43 = vsel %vm909_vm2, %v2014_v39, 0 }
 0x677   : > { %v1650_v44 = vadd.f32 %v3486_v42, %v3206_v24  ;;  %v1641_v47 = vpop.f32.mrb[25].mxu0  ;;  %3517 = vmatpush3.bf16.xpose.msra.mxu0 %v2242_v43 }
 0x678   : > { %v1642_v48 = vadd.f32 %v3206_v24, %v1641_v47  ;;  %v3487_v49 = vpop.f32.mrb[26].mxu0  ;;  %3518 = vmatprep.subr.bf16.mxu0 %v4114_v1 }
 0x679   : > { %v1653_v51 = vadd.f32 %v3487_v49, %v3206_v24  ;;  %v1644_v52 = vpop.f32.mrb[27].mxu0 }
 0x67a   : > { %v1645_v53 = vadd.f32 %v3206_v24, %v1644_v52  ;;  %v3197_v52 = vld [vmem:[%s5105_s18] ss:$0 sm:$0xff] }
 0x67b   : > { %v4547_v56 = vpack.i.bf16 %v1653_v51, %v1650_v44  ;;  %v2017_v22 = vpack.c.bf16 %v1653_v51, %v1650_v44 }
 0x67c   : > { %v4549_v57 = vpack.i.bf16 %v1645_v53, %v1642_v48  ;;  %v2016_v5 = vpack.c.bf16 %v1645_v53, %v1642_v48 }
 0x67d   : > { %3768 = vrot.lane.b32.xlu0 %v4547_v56, %s5144_s5  ;;  %v2251_v33 = vsel %vm909_vm2, %v2017_v22, 0 }
 0x67e   : > { %v3490_v61 = vpop.f32.mrb[28].mxu0  ;;  %3763 = vrot.lane.b32.xlu1 %v4549_v57, %s5144_s5  ;;  %v2248_v13 = vsel %vm909_vm2, %v2016_v5, 0 }
 0x67f   : > { %v1666_v62 = vadd.f32 %v3490_v61, %v3206_v24  ;;  %v1657_v63 = vpop.f32.mrb[29].mxu0  ;;  %3519 = vmatpush3.bf16.xpose.msra.mxu0 %v2245_v58 }
 0x680   : > { %v1658_v0 = vadd.f32 %v3206_v24, %v1657_v63  ;;  %v3491_v2 = vpop.f32.mrb[30].mxu0  ;;  %3520 = vmatprep.subr.bf16.mxu0 %v4114_v1 }
 0x681   : > { %v1669_v6 = vadd.f32 %v3491_v2, %v3206_v24  ;;  %v1660_v8 = vpop.f32.mrb[31].mxu0 }
 0x682   : > { %v1661_v10 = vadd.f32 %v3206_v24, %v1660_v8 }
 0x683   : > { %v4557_v11 = vpack.i.bf16 %v1669_v6, %v1666_v62  ;;  %v2019_v35 = vpack.c.bf16 %v1669_v6, %v1666_v62  ;;  %v1688_v62 = vpack.c.bf16 %v4431_v21, %v4428_v20  ;;  %v1691_v20 = vpack.c.bf16 %v4462_v41, %v4459_v40 }
 0x684   : > { %v4559_v12 = vpack.i.bf16 %v1661_v10, %v1658_v0  ;;  %v2018_v34 = vpack.c.bf16 %v1661_v10, %v1658_v0  ;;  %v1689_v0 = vpack.c.bf16 %v4441_v27, %v4438_v26  ;;  %v1692_v21 = vpack.c.bf16 %v4470_v46, %v4467_v45 }
 0x685   : > { %3778 = vrot.lane.b32.xlu0 %v4557_v11, %s5144_s5  ;;  %v2257_v36 = vsel %vm909_vm2, %v2019_v35, 0  ;;  %v1693_v26 = vpack.c.bf16 %v4485_v55, %v4482_v54  ;;  %v1694_v27 = vpack.c.bf16 %v4493_v60, %v4490_v59 }
 0x686   : > { %v3494_v14 = vpop.f32.mrb[32].mxu0  ;;  %3773 = vrot.lane.b32.xlu1 %v4559_v12, %s5144_s5 }
 0x687   : > { %v1682_v15 = vadd.f32 %v3494_v14, %v3206_v24  ;;  %v1673_v16 = vpop.f32.mrb[33].mxu0  ;;  %3521 = vmatpush3.bf16.xpose.msra.mxu0 %v2248_v13 }
 0x688   : > { %v1674_v3 = vadd.f32 %v3206_v24, %v1673_v16  ;;  %v3495_v19 = vpop.f32.mrb[34].mxu0  ;;  %3522 = vmatprep.subr.bf16.mxu0 %v4114_v1 }
 0x689   : > { %v1685_v23 = vadd.f32 %v3495_v19, %v3206_v24  ;;  %v1676_v25 = vpop.f32.mrb[35].mxu0 }
 0x68a   : > { %v1677_v28 = vadd.f32 %v3206_v24, %v1676_v25  ;;  %v2254_v24 = vsel %vm909_vm2, %v2018_v34, 0 }
 0x68b   : > { %v4567_v29 = vpack.i.bf16 %v1685_v23, %v1682_v15  ;;  %v2021_v47 = vpack.c.bf16 %v1685_v23, %v1682_v15 }
 0x68c   : > { %v4569_v30 = vpack.i.bf16 %v1677_v28, %v1674_v3 }
 0x68d   : > { %3788 = vrot.lane.b32.xlu0 %v4567_v29, %s5144_s5  ;;  %v2263_v48 = vsel %vm909_vm2, %v2021_v47, 0 }
 0x68e   : > { %3783 = vrot.lane.b32.xlu1 %v4569_v30, %s5144_s5 }
 0x68f   : > { %3523 = vmatpush3.bf16.xpose.msra.mxu0 %v2251_v33 }
 0x690   : > { %3524 = vmatprep.subr.bf16.mxu0 %v4114_v1 }
 0x691   : > { %3798 = vrot.lane.b32.xlu0 %v3752_v38, %s5145_s30 }
 0x692   : > { %3793 = vrot.lane.b32.xlu1 %v3752_v38, %s5146_s23  ;;  %v2020_v38 = vpack.c.bf16 %v1677_v28, %v1674_v3 }
 0x694   : > { %v2260_v44 = vsel %vm909_vm2, %v2020_v38, 0 }
 0x695   : > { %3803 = vrot.lane.b32.xlu0 %v4540_v37, %s5146_s23 }
 0x697   : > { %3525 = vmatpush3.bf16.xpose.msra.mxu0 %v2254_v24 }
 0x698   : > { %3526 = vmatprep.subr.bf16.mxu0 %v4114_v1 }
 0x699   : > { %3813 = vrot.lane.b32.xlu0 %v4549_v57, %s5146_s23 }
 0x69d   : > { %3823 = vrot.lane.b32.xlu0 %v4547_v56, %s5146_s23 }
 0x69f   : > { %3527 = vmatpush3.bf16.xpose.msra.mxu0 %v2257_v36 }
 0x6a0   : > { %3528 = vmatprep.subr.bf16.mxu0 %v4114_v1 }
 0x6a1   : > { %3833 = vrot.lane.b32.xlu0 %v4559_v12, %s5146_s23 }
 0x6a5   : > { %3843 = vrot.lane.b32.xlu0 %v4557_v11, %s5146_s23 }
 0x6a7   : > { %3529 = vmatpush3.bf16.xpose.msra.mxu0 %v2260_v44 }
 0x6a8   : > { %3530 = vmatprep.subr.bf16.mxu0 %v4114_v1 }
 0x6a9   : > { %3853 = vrot.lane.b32.xlu0 %v4569_v30, %s5146_s23 }
 0x6ad   : > { %3863 = vrot.lane.b32.xlu0 %v4567_v29, %s5146_s23 }
 0x6af   : > { %3531 = vmatpush3.bf16.xpose.msra.mxu0 %v2263_v48 }
 0x6b0   : > { %3556 = vmatprep.subr.bf16.mxu0 %v4114_v1 }
 0x6b7   : > { %v1440_v39 = vpop.xlane.xlu0 %1439 }
 0x6b8   : > { %v1441_v42 = vmul.f32 0.03125, %v1440_v39 }
 0x6ba   : > { %v1442_v43 = vadd.f32 1e-05, %v1441_v42 }
 0x6bc   : > { %4028 = vrsqrt.f32 %v1442_v43 }
 0x6c6   : > { %v4029_v49 = vpop.eup %4028 }
 0x6c7   : > { %v1444_v51 = vmul.f32 %v4029_v49, %v4519_v18  ;;  %v4003_v18 = vld [vmem:[%s5098_s11 + $0x28] sm:$0xff]  }
 0x6c9   : > { %v1449_v53 = vmul.f32 %v3196_v50, %v1444_v51 }
 0x6cb   : > { %v4608_v58 = vadd.f32 %v3197_v52, %v1449_v53 }
 0x6cd   : > { %v1455_v61 = vadd.f32 %v4608_v58, %v4308_v4  ;;  %v1690_v4 = vpack.c.bf16 %v4450_v32, %v4447_v31  ;;  %v1695_v31 = vpack.c.bf16 %v4507_v9, %v4504_v7 }
 0x6cf   : > { %v1472_v63 = vpack.c.bf16 %v1455_v61, %v1455_v61  ;;  %v3198_v61 = vld [vmem:[%s5099_s12] ss:$0 sm:$0xff] }
 0x6d1   : > { %3473 = vmatmul.mubr.msk.bf16.vlgmr.msra.gmra.mrb[24].mxu1 %vm767_vm1, %v1472_v63 }
 0x6d2   : > { %3497 = vmatpush3.bf16.msra.mxu1 %v4534_v17  ;;  %3500 = vmatprep.mubr.msk.bf16.mxu1 %vm767_vm1, %v1688_v62 }
 0x6d3   : > { %3498 = vmatprep.subr.bf16.mxu1 %v4003_v18 }
 0x6d6   : > { %3499 = vmatpush3.bf16.msra.mxu1 %v4003_v18 }
 0x6d7   : > { %3536 = vmatprep.subr.bf16.mxu1 %v4114_v1 }
 0x6d9   : > { %3501 = vmatmul.mubr.msk.bf16.vlgmr.msra.gmra.mrb[28].mxu1 %vm767_vm1, %v1689_v0 }
 0x6da   : > { %3504 = vmatprep.mubr.msk.bf16.mxu1 %vm767_vm1, %v1690_v4 }
 0x6e1   : > { %3505 = vmatmul.mubr.msk.bf16.gmra.mrb[32].mxu1 %vm767_vm1, %v1691_v20 }
 0x6e2   : > { %3508 = vmatprep.mubr.msk.bf16.mxu1 %vm767_vm1, %v1692_v21 }
 0x6e7   : > { %v3759_v46 = vpop.permute.xlu1 %3758 }
 0x6e8   : > { %v3754_v32 = vpop.permute.xlu0 %3753  ;;  %v3761_v54 = vunpack.i.h.bf16 %v3759_v46  ;;  %v3760_v55 = vunpack.i.l.bf16 %v3759_v46 }
 0x6e9   : > { %3509 = vmatmul.mubr.msk.bf16.gmra.mrb[36].mxu1 %vm767_vm1, %v1693_v26  ;;  %v3756_v40 = vunpack.i.h.bf16 %v3754_v32  ;;  %v3755_v41 = vunpack.i.l.bf16 %v3754_v32 }
 0x6ea   : > { %3512 = vmatprep.mubr.msk.bf16.mxu1 %vm767_vm1, %v1694_v27  ;;  %v2023_v60 = vpack.c.bf16 %v3761_v54, %v3760_v55 }
 0x6eb   : > { %v2022_v45 = vpack.c.bf16 %v3756_v40, %v3755_v41 }
 0x6ec   : > { %v2312_v2 = vsel %vm909_vm2, %v2023_v60, 0 }
 0x6ed   : > { %v2309_v59 = vsel %vm909_vm2, %v2022_v45, 0 }
 0x6ee   : > { %3537 = vmatpush3.bf16.xpose.msra.mxu1 %v2309_v59 }
 0x6ef   : > { %3538 = vmatprep.subr.bf16.mxu1 %v4114_v1  ;;  %v3769_v6 = vpop.permute.xlu0 %3768 }
 0x6f0   : > { %v3764_v17 = vpop.permute.xlu1 %3763  ;;  %v3771_v8 = vunpack.i.h.bf16 %v3769_v6  ;;  %v3770_v10 = vunpack.i.l.bf16 %v3769_v6 }
 0x6f1   : > { %3513 = vmatmul.mubr.msk.bf16.gmra.mrb[40].mxu1 %vm767_vm1, %v1695_v31  ;;  %v3766_v7 = vunpack.i.h.bf16 %v3764_v17  ;;  %v3765_v9 = vunpack.i.l.bf16 %v3764_v17 }
 0x6f2   : > { %3552 = vmatprep.mubr.msk.bf16.mxu1 %vm4115_vm0, %v4114_v1  ;;  %v2025_v14 = vpack.c.bf16 %v3771_v8, %v3770_v10 }
 0x6f3   : > { %v2024_v5 = vpack.c.bf16 %v3766_v7, %v3765_v9  ;;  %v4689_v9 = vld [vmem:[%s5099_s12 + $0x2] ss:$0 sm:$0xff] }
 0x6f4   : > { %v2318_v19 = vsel %vm909_vm2, %v2025_v14, 0 }
 0x6f5   : > { %v2315_v13 = vsel %vm909_vm2, %v2024_v5, 0 }
 0x6f6   : > { %3539 = vmatpush3.bf16.xpose.msra.mxu1 %v2312_v2 }
 0x6f7   : > { %3540 = vmatprep.subr.bf16.mxu1 %v4114_v1  ;;  %v3779_v23 = vpop.permute.xlu0 %3778 }
 0x6f8   : > { %v3774_v15 = vpop.permute.xlu1 %3773  ;;  %v3781_v25 = vunpack.i.h.bf16 %v3779_v23  ;;  %v3780_v28 = vunpack.i.l.bf16 %v3779_v23 }
 0x6f9   : > { %v3776_v16 = vunpack.i.h.bf16 %v3774_v15  ;;  %v3775_v3 = vunpack.i.l.bf16 %v3774_v15 }
 0x6fa   : > { %v2027_v34 = vpack.c.bf16 %v3781_v25, %v3780_v28 }
 0x6fb   : > { %v2026_v22 = vpack.c.bf16 %v3776_v16, %v3775_v3 }
 0x6fc   : > { %v2324_v39 = vsel %vm909_vm2, %v2027_v34, 0 }
 0x6fd   : > { %v2321_v33 = vsel %vm909_vm2, %v2026_v22, 0 }
 0x6fe   : > { %3541 = vmatpush3.bf16.xpose.msra.mxu1 %v2315_v13 }
 0x6ff   : > { %3542 = vmatprep.subr.bf16.mxu1 %v4114_v1  ;;  %v3789_v38 = vpop.permute.xlu0 %3788 }
 0x700   : > { %v3784_v24 = vpop.permute.xlu1 %3783  ;;  %v3791_v43 = vunpack.i.h.bf16 %v3789_v38  ;;  %v3790_v44 = vunpack.i.l.bf16 %v3789_v38 }
 0x701   : > { %v3786_v35 = vunpack.i.h.bf16 %v3784_v24  ;;  %v3785_v36 = vunpack.i.l.bf16 %v3784_v24 }
 0x702   : > { %v2029_v48 = vpack.c.bf16 %v3791_v43, %v3790_v44 }
 0x703   : > { %v2028_v42 = vpack.c.bf16 %v3786_v35, %v3785_v36  ;;  %v4660_v51 = vpop.permute.xlu0 %3798 }
 0x704   : > { %v2330_v49 = vsel %vm909_vm2, %v2029_v48, 0  ;;  %v3794_v50 = vpop.permute.xlu1 %3793 }
 0x705   : > { %v2327_v47 = vsel %vm909_vm2, %v2028_v42, 0  ;;  %v3796_v52 = vunpack.i.h.bf16 %v3794_v50  ;;  %v3795_v53 = vunpack.i.l.bf16 %v3794_v50 }
 0x706   : > { %3543 = vmatpush3.bf16.xpose.msra.mxu1 %v2318_v19 }
 0x707   : > { %3544 = vmatprep.subr.bf16.mxu1 %v4114_v1  ;;  %v2030_v62 = vpack.c.bf16 %v3796_v52, %v3795_v53  ;;  %v3804_v18 = vpop.permute.xlu0 %3803 }
 0x708   : > { %v3806_v31 = vunpack.i.h.bf16 %v3804_v18  ;;  %v3805_v32 = vunpack.i.l.bf16 %v3804_v18 }
 0x709   : > { %v2376_v27 = vsel %vm909_vm2, %v2030_v62, 0 }
 0x70a   : > { %v2031_v40 = vpack.c.bf16 %v3806_v31, %v3805_v32 }
 0x70b   : > { %v3814_v41 = vpop.permute.xlu0 %3813 }
 0x70c   : > { %v2379_v45 = vsel %vm909_vm2, %v2031_v40, 0  ;;  %v3816_v46 = vunpack.i.h.bf16 %v3814_v41  ;;  %v3815_v54 = vunpack.i.l.bf16 %v3814_v41 }
 0x70e   : > { %3545 = vmatpush3.bf16.xpose.msra.mxu1 %v2321_v33  ;;  %v2032_v55 = vpack.c.bf16 %v3816_v46, %v3815_v54 }
 0x70f   : > { %3546 = vmatprep.subr.bf16.mxu1 %v4114_v1  ;;  %v3824_v59 = vpop.permute.xlu0 %3823 }
 0x710   : > { %v3826_v60 = vunpack.i.h.bf16 %v3824_v59  ;;  %v3825_v17 = vunpack.i.l.bf16 %v3824_v59 }
 0x713   : > { %v3834_v7 = vpop.permute.xlu0 %3833 }
 0x714   : > { %v3836_v5 = vunpack.i.h.bf16 %v3834_v7  ;;  %v3835_v6 = vunpack.i.l.bf16 %v3834_v7 }
 0x716   : > { %3547 = vmatpush3.bf16.xpose.msra.mxu1 %v2324_v39  ;;  %v2034_v13 = vpack.c.bf16 %v3836_v5, %v3835_v6 }
 0x717   : > { %3548 = vmatprep.subr.bf16.mxu1 %v4114_v1  ;;  %v3844_v14 = vpop.permute.xlu0 %3843 }
 0x718   : > { %v2388_v15 = vsel %vm909_vm2, %v2034_v13, 0  ;;  %v3846_v16 = vunpack.i.h.bf16 %v3844_v14  ;;  %v3845_v3 = vunpack.i.l.bf16 %v3844_v14 }
 0x71a   : > { %v2035_v19 = vpack.c.bf16 %v3846_v16, %v3845_v3 }
 0x71c   : > { %v2391_v33 = vsel %vm909_vm2, %v2035_v19, 0 }
 0x71e   : > { %3549 = vmatpush3.bf16.xpose.msra.mxu1 %v2327_v47 }
 0x71f   : > { %3550 = vmatprep.subr.bf16.mxu1 %v4114_v1 }
 0x726   : > { %3551 = vmatpush3.bf16.xpose.msra.mxu1 %v2330_v49 }
 0x727   : > { %3576 = vmatprep.subr.bf16.mxu1 %v4114_v1 }
 0x7a4   : > { %v1531_v63 = vpop.f32.mrb[24].mxu1 }
 0x7a5   : > { %v1532_v0 = vadd.f32 %v3198_v61, %v1531_v63  ;;  %v3474_v4 = vpop.f32.mrb[25].mxu1 }
 0x7a6   : > { %v1534_v20 = vpop.f32.mrb[26].mxu1 }
 0x7a7   : > { %v1850_v21 = vpack.c.bf16 %v1532_v0, %v1532_v0  ;;  %1844 = vrot.lane.b32.xlu0 %v1532_v0, %s5146_s23  ;;  %1841 = vrot.lane.b32.xlu1 %v1532_v0, %s5144_s5  ;;  %v3475_v26 = vpop.f32.mrb[27].mxu1 }
 0x7a9   : > { %3533 = vmatmul.mubr.msk.bf16.vlgmr.msra.gmra.mrb[36].mxu0 %vm909_vm2, %v1850_v21 }
 0x7aa   : > { %3557 = vmatpush3.bf16.xpose.msra.mxu0 %v2376_v27  ;;  %3572 = vmatprep.mubr.msk.bf16.mxu0 %vm4115_vm0, %v4114_v1 }
 0x7ab   : > { %3808 = vrot.lane.b32.xlu1 %v4540_v37, %s5145_s30  ;;  %3558 = vmatprep.subr.bf16.mxu0 %v4114_v1  ;;  %v2382_v37 = vsel %vm909_vm2, %v2032_v55, 0 }
 0x7af   : > { %3818 = vrot.lane.b32.xlu1 %v4549_v57, %s5145_s30  ;;  %v2033_v57 = vpack.c.bf16 %v3826_v60, %v3825_v17 }
 0x7b2   : > { %3559 = vmatpush3.bf16.xpose.msra.mxu0 %v2379_v45 }
 0x7b3   : > { %3828 = vrot.lane.b32.xlu1 %v4547_v56, %s5145_s30  ;;  %3560 = vmatprep.subr.bf16.mxu0 %v4114_v1  ;;  %v3502_v56 = vpop.f32.mrb[28].mxu1 }
 0x7b4   : > { %v1776_v2 = vpop.f32.mrb[29].mxu1 }
 0x7b5   : > { %v3503_v8 = vpop.f32.mrb[30].mxu1  ;;  %v4711_v22 = vadd.f32 %v4689_v9, %v1776_v2  ;;  %v3801_v2 = vunpack.i.h.bf16 %v4660_v51 }
 0x7b6   : > { %v4698_v10 = vadd.f32 %v3503_v8, %v4689_v9  ;;  %v1779_v23 = vpop.f32.mrb[31].mxu1 }
 0x7b7   : > { %3838 = vrot.lane.b32.xlu1 %v4559_v12, %s5145_s30  ;;  %v2385_v12 = vsel %vm909_vm2, %v2033_v57, 0  ;;  %v4714_v25 = vadd.f32 %v4689_v9, %v1779_v23  ;;  %v3506_v28 = vpop.f32.mrb[32].mxu1 }
 0x7b8   : > { %v1792_v35 = vpop.f32.mrb[33].mxu1  ;;  %v4721_v42 = vadd.f32 %v3506_v28, %v4689_v9 }
 0x7b9   : > { %v3507_v36 = vpop.f32.mrb[34].mxu1  ;;  %v3892_v39 = vpack.i.bf16 %v4714_v25, %v4711_v22  ;;  %v4729_v47 = vadd.f32 %v4689_v9, %v1792_v35  ;;  %v2206_v57 = vpack.c.bf16 %v4714_v25, %v4711_v22 }
 0x7ba   : > { %3561 = vmatpush3.bf16.xpose.msra.mxu0 %v2382_v37  ;;  %v4724_v38 = vadd.f32 %v3507_v36, %v4689_v9  ;;  %v1795_v48 = vpop.f32.mrb[35].mxu1 }
 0x7bb   : > { %3848 = vrot.lane.b32.xlu1 %v4557_v11, %s5145_s30  ;;  %3562 = vmatprep.subr.bf16.mxu0 %v4114_v1  ;;  %v4695_v11 = vadd.f32 %v3502_v56, %v4689_v9  ;;  %v4734_v50 = vadd.f32 %v4689_v9, %v1795_v48 }
 0x7bc   : > { %v3902_v49 = vpack.i.bf16 %v4724_v38, %v4721_v42  ;;  %v3510_v52 = vpop.f32.mrb[36].mxu1 }
 0x7bd   : > { %v4738_v63 = vadd.f32 %v3510_v52, %v4689_v9  ;;  %v1808_v18 = vpop.f32.mrb[37].mxu1  ;;  %v3927_v20 = vpack.i.bf16 %v4734_v50, %v4729_v47  ;;  %v2207_v7 = vpack.c.bf16 %v4698_v10, %v4695_v11  ;;  %v2208_v56 = vpack.c.bf16 %v4734_v50, %v4729_v47 }
 0x7be   : > { %v3511_v4 = vpop.f32.mrb[38].mxu1 }
 0x7bf   : > { %3858 = vrot.lane.b32.xlu1 %v4569_v30, %s5145_s30  ;;  %v3872_v30 = vpack.i.bf16 %v4698_v10, %v4695_v11  ;;  %v4747_v21 = vadd.f32 %v3511_v4, %v4689_v9  ;;  %v1811_v26 = vpop.f32.mrb[39].mxu1 }
 0x7c0   : > { %v4750_v27 = vadd.f32 %v4689_v9, %v1811_v26 }
 0x7c1   : > { %3873 = vrot.lane.b32.xlu0 %v3872_v30, %s5144_s5  ;;  %v4798_v5 = vpack.i.bf16 %v4747_v21, %v4738_v63  ;;  %v2211_v36 = vpack.c.bf16 %v4747_v21, %v4738_v63 }
 0x7c2   : > { %3563 = vmatpush3.bf16.xpose.msra.mxu0 %v2385_v12  ;;  %v3800_v12 = vunpack.i.l.bf16 %v4660_v51 }
 0x7c3   : > { %3868 = vrot.lane.b32.xlu1 %v4567_v29, %s5145_s30  ;;  %3564 = vmatprep.subr.bf16.mxu0 %v4114_v1  ;;  %v3854_v29 = vpop.permute.xlu0 %3853 }
 0x7c4   : > { %v3856_v34 = vunpack.i.h.bf16 %v3854_v29  ;;  %v3855_v24 = vunpack.i.l.bf16 %v3854_v29  ;;  %v3514_v31 = vpop.f32.mrb[40].mxu1  ;;  %v2038_v6 = vpack.c.bf16 %v3801_v2, %v3800_v12 }
 0x7c5   : > { %3878 = vrot.lane.b32.xlu0 %v3872_v30, %s5146_s23  ;;  %v4754_v40 = vadd.f32 %v3514_v31, %v4689_v9  ;;  %v1824_v41 = vpop.f32.mrb[41].mxu1 }
 0x7c6   : > { %v2036_v43 = vpack.c.bf16 %v3856_v34, %v3855_v24  ;;  %v4758_v45 = vadd.f32 %v4689_v9, %v1824_v41  ;;  %v3515_v46 = vpop.f32.mrb[42].mxu1  ;;  %v2443_v51 = vsel %vm909_vm2, %v2038_v6, 0 }
 0x7c7   : > { %1847 = vrot.lane.b32.xlu1 %v1532_v0, %s5145_s30  ;;  %v3864_v44 = vpop.permute.xlu0 %3863  ;;  %v4742_v0 = vadd.f32 %v4689_v9, %v1808_v18  ;;  %v4765_v55 = vadd.f32 %v3515_v46, %v4689_v9  ;;  %v1827_v59 = vpop.f32.mrb[43].mxu1 }
 0x7c8   : > { %v2394_v53 = vsel %vm909_vm2, %v2036_v43, 0  ;;  %v3866_v61 = vunpack.i.h.bf16 %v3864_v44  ;;  %v3865_v62 = vunpack.i.l.bf16 %v3864_v44  ;;  %v4768_v37 = vadd.f32 %v4689_v9, %v1827_v59 }
 0x7c9   : > { %3883 = vrot.lane.b32.xlu0 %v3872_v30, %s5145_s30  ;;  %v4762_v54 = vpack.i.bf16 %v4750_v27, %v4742_v0  ;;  %v2209_v9 = vpack.c.bf16 %v4724_v38, %v4721_v42  ;;  %v4813_v16 = vpack.i.bf16 %v4765_v55, %v4754_v40  ;;  %v2213_v48 = vpack.c.bf16 %v4765_v55, %v4754_v40  ;;  %v4855_v55 = vld [vmem:[%s702_s28] ss:$0 sm:$0xff] }
 0x7ca   : > { %3565 = vmatpush3.bf16.xpose.msra.mxu0 %v2388_v15  ;;  %v2037_v32 = vpack.c.bf16 %v3866_v61, %v3865_v62  ;;  %v4775_v17 = vpack.i.bf16 %v4768_v37, %v4758_v45  ;;  %v2212_v38 = vpack.c.bf16 %v4768_v37, %v4758_v45 }
 0x7cb   : > { %3566 = vmatprep.subr.bf16.mxu0 %v4114_v1  ;;  %3888 = vrot.lane.b32.xlu1 %v3892_v39, %s5144_s5 }
 0x7cc   : > { %v2397_v60 = vsel %vm909_vm2, %v2037_v32, 0 }
 0x7cd   : > { %3893 = vrot.lane.b32.xlu0 %v3892_v39, %s5146_s23 }
 0x7cf   : > { %3898 = vrot.lane.b32.xlu1 %v3892_v39, %s5145_s30 }
 0x7d1   : > { %3903 = vrot.lane.b32.xlu0 %v3902_v49, %s5144_s5 }
 0x7d2   : > { %3567 = vmatpush3.bf16.xpose.msra.mxu0 %v2391_v33  ;;  %v2210_v33 = vpack.c.bf16 %v4750_v27, %v4742_v0 }
 0x7d3   : > { %3568 = vmatprep.subr.bf16.mxu0 %v4114_v1  ;;  %3908 = vrot.lane.b32.xlu1 %v3902_v49, %s5146_s23 }
 0x7d5   : > { %3928 = vrot.lane.b32.xlu0 %v3927_v20, %s5145_s30 }
 0x7d7   : > { %3913 = vrot.lane.b32.xlu1 %v3902_v49, %s5145_s30 }
 0x7d9   : > { %3943 = vrot.lane.b32.xlu0 %v4762_v54, %s5146_s23 }
 0x7da   : > { %3569 = vmatpush3.bf16.xpose.msra.mxu0 %v2394_v53 }
 0x7db   : > { %3570 = vmatprep.subr.bf16.mxu0 %v4114_v1  ;;  %3918 = vrot.lane.b32.xlu1 %v3927_v20, %s5144_s5 }
 0x7dd   : > { %3953 = vrot.lane.b32.xlu0 %v4775_v17, %s5144_s5 }
 0x7df   : > { %3923 = vrot.lane.b32.xlu1 %v3927_v20, %s5146_s23 }
 0x7e2   : > { %3571 = vmatpush3.bf16.xpose.msra.mxu0 %v2397_v60 }
 0x7e3   : > { %3596 = vmatprep.subr.bf16.mxu0 %v4114_v1  ;;  %3933 = vrot.lane.b32.xlu1 %v4798_v5, %s5144_s5 }
 0x7e7   : > { %3938 = vrot.lane.b32.xlu1 %v4762_v54, %s5144_s5 }
 0x7eb   : > { %3948 = vrot.lane.b32.xlu1 %v4813_v16, %s5144_s5  ;;  %s5149_s5 = smov 16  }
 0x819   : > { %v1845_v8 = vpop.permute.xlu0 %1844  ;;  %v1842_v11 = vpop.permute.xlu1 %1841 }
 0x81a   : > { %v1852_v10 = vpack.c.bf16 %v1845_v8, %v1845_v8  ;;  %v1851_v13 = vpack.c.bf16 %v1842_v11, %v1842_v11 }
 0x81c   : > { %3553 = vmatmul.mubr.msk.bf16.vlgmr.msra.gmra.mrb[44].mxu1 %vm909_vm2, %v1851_v13  ;;  %3573 = vmatmul.mubr.msk.bf16.vlgmr.msra.gmra.mrb[40].mxu0 %vm909_vm2, %v1852_v10 }
 0x81d   : > { %3577 = vmatpush3.bf16.xpose.msra.mxu1 %v2443_v51  ;;  %v3809_v14 = vpop.permute.xlu1 %3808  ;;  %3592 = vmatprep.mubr.msk.bf16.mxu1 %vm4115_vm0, %v4114_v1 }
 0x81e   : > { %v3811_v30 = vunpack.i.h.bf16 %v3809_v14  ;;  %v3810_v15 = vunpack.i.l.bf16 %v3809_v14  ;;  %3578 = vmatprep.subr.bf16.mxu1 %v4114_v1  ;;  %3597 = vmatpush3.bf16.msra.mxu0 %v2206_v57 }
 0x81f   : > { %3598 = vmatprep.subr.bf16.mxu0 %v4114_v1  ;;  %3612 = vmatprep.mubr.msk.bf16.mxu0 %vm4115_vm0, %v4114_v1 }
 0x820   : > { %v2039_v3 = vpack.c.bf16 %v3811_v30, %v3810_v15 }
 0x821   : > { %v3819_v19 = vpop.permute.xlu1 %3818 }
 0x822   : > { %v2446_v29 = vsel %vm909_vm2, %v2039_v3, 0  ;;  %3599 = vmatpush3.bf16.msra.mxu0 %v2207_v7  ;;  %v3821_v22 = vunpack.i.h.bf16 %v3819_v19  ;;  %v3820_v23 = vunpack.i.l.bf16 %v3819_v19 }
 0x823   : > { %3600 = vmatprep.subr.bf16.mxu0 %v4114_v1 }
 0x824   : > { %v2040_v25 = vpack.c.bf16 %v3821_v22, %v3820_v23 }
 0x825   : > { %3579 = vmatpush3.bf16.xpose.msra.mxu1 %v2446_v29  ;;  %v3829_v28 = vpop.permute.xlu1 %3828 }
 0x826   : > { %3580 = vmatprep.subr.bf16.mxu1 %v4114_v1  ;;  %3601 = vmatpush3.bf16.msra.mxu0 %v2208_v56  ;;  %v3831_v34 = vunpack.i.h.bf16 %v3829_v28  ;;  %v3830_v24 = vunpack.i.l.bf16 %v3829_v28  ;;  %v2449_v35 = vsel %vm909_vm2, %v2040_v25, 0 }
 0x827   : > { %3602 = vmatprep.subr.bf16.mxu0 %v4114_v1 }
 0x828   : > { %v2041_v39 = vpack.c.bf16 %v3831_v34, %v3830_v24 }
 0x829   : > { %v3839_v42 = vpop.permute.xlu1 %3838 }
 0x82a   : > { %3603 = vmatpush3.bf16.msra.mxu0 %v2209_v9  ;;  %v3841_v43 = vunpack.i.h.bf16 %v3839_v42  ;;  %v3840_v44 = vunpack.i.l.bf16 %v3839_v42  ;;  %v2452_v47 = vsel %vm909_vm2, %v2041_v39, 0 }
 0x82b   : > { %3604 = vmatprep.subr.bf16.mxu0 %v4114_v1 }
 0x82c   : > { %v2042_v49 = vpack.c.bf16 %v3841_v43, %v3840_v44 }
 0x82d   : > { %3581 = vmatpush3.bf16.xpose.msra.mxu1 %v2449_v35  ;;  %v3849_v50 = vpop.permute.xlu1 %3848 }
 0x82e   : > { %3582 = vmatprep.subr.bf16.mxu1 %v4114_v1  ;;  %3605 = vmatpush3.bf16.msra.mxu0 %v2210_v33  ;;  %v3851_v52 = vunpack.i.h.bf16 %v3849_v50  ;;  %v3850_v53 = vunpack.i.l.bf16 %v3849_v50  ;;  %v2455_v61 = vsel %vm909_vm2, %v2042_v49, 0 }
 0x82f   : > { %3606 = vmatprep.subr.bf16.mxu0 %v4114_v1 }
 0x830   : > { %v2043_v62 = vpack.c.bf16 %v3851_v52, %v3850_v53 }
 0x831   : > { %v3859_v63 = vpop.permute.xlu1 %3858 }
 0x832   : > { %3607 = vmatpush3.bf16.msra.mxu0 %v2211_v36  ;;  %v3861_v18 = vunpack.i.h.bf16 %v3859_v63  ;;  %v3860_v0 = vunpack.i.l.bf16 %v3859_v63  ;;  %v2458_v4 = vsel %vm909_vm2, %v2043_v62, 0 }
 0x833   : > { %3608 = vmatprep.subr.bf16.mxu0 %v4114_v1  ;;  %v3874_v56 = vpop.permute.xlu0 %3873 }
 0x834   : > { %v2044_v20 = vpack.c.bf16 %v3861_v18, %v3860_v0  ;;  %v3876_v2 = vunpack.i.h.bf16 %v3874_v56  ;;  %v3875_v12 = vunpack.i.l.bf16 %v3874_v56 }
 0x835   : > { %3583 = vmatpush3.bf16.xpose.msra.mxu1 %v2452_v47  ;;  %v3869_v21 = vpop.permute.xlu1 %3868 }
 0x836   : > { %3584 = vmatprep.subr.bf16.mxu1 %v4114_v1  ;;  %3609 = vmatpush3.bf16.msra.mxu0 %v2212_v38  ;;  %v3871_v26 = vunpack.i.h.bf16 %v3869_v21  ;;  %v3870_v27 = vunpack.i.l.bf16 %v3869_v21  ;;  %v2461_v31 = vsel %vm909_vm2, %v2044_v20, 0  ;;  %v2215_v10 = vpack.c.bf16 %v3876_v2, %v3875_v12 }
 0x837   : > { %3610 = vmatprep.subr.bf16.mxu0 %v4114_v1  ;;  %v4862_v13 = vpop.permute.xlu0 %3878 }
 0x838   : > { %v2045_v32 = vpack.c.bf16 %v3871_v26, %v3870_v27 }
 0x839   : > { %v1848_v41 = vpop.permute.xlu1 %1847 }
 0x83a   : > { %3611 = vmatpush3.bf16.msra.mxu0 %v2213_v48  ;;  %v2464_v40 = vsel %vm909_vm2, %v2045_v32, 0  ;;  %v1853_v45 = vpack.c.bf16 %v1848_v41, %v1848_v41 }
 0x83b   : > { %3636 = vmatprep.subr.bf16.mxu0 %v4114_v1  ;;  %v4867_v14 = vpop.permute.xlu0 %3883 }
 0x83d   : > { %3585 = vmatpush3.bf16.xpose.msra.mxu1 %v2455_v61  ;;  %v3889_v9 = vpop.permute.xlu1 %3888 }
 0x83e   : > { %3586 = vmatprep.subr.bf16.mxu1 %v4114_v1  ;;  %v3891_v6 = vunpack.i.h.bf16 %v3889_v9  ;;  %v3890_v8 = vunpack.i.l.bf16 %v3889_v9 }
 0x83f   : > { %v4871_v15 = vpop.permute.xlu0 %3893 }
 0x840   : > { %v2214_v11 = vpack.c.bf16 %v3891_v6, %v3890_v8 }
 0x841   : > { %v4864_v51 = vpop.permute.xlu1 %3898 }
 0x843   : > { %v3904_v19 = vpop.permute.xlu0 %3903 }
 0x844   : > { %v3906_v22 = vunpack.i.h.bf16 %v3904_v19  ;;  %v3905_v23 = vunpack.i.l.bf16 %v3904_v19 }
 0x845   : > { %3587 = vmatpush3.bf16.xpose.msra.mxu1 %v2458_v4  ;;  %v4869_v30 = vpop.permute.xlu1 %3908 }
 0x846   : > { %3588 = vmatprep.subr.bf16.mxu1 %v4114_v1  ;;  %v2217_v34 = vpack.c.bf16 %v3906_v22, %v3905_v23 }
 0x847   : > { %v4876_v24 = vpop.permute.xlu0 %3928 }
 0x849   : > { %v4873_v3 = vpop.permute.xlu1 %3913 }
 0x84b   : > { %v4881_v39 = vpop.permute.xlu0 %3943 }
 0x84d   : > { %3589 = vmatpush3.bf16.xpose.msra.mxu1 %v2461_v31  ;;  %v3919_v29 = vpop.permute.xlu1 %3918 }
 0x84e   : > { %3590 = vmatprep.subr.bf16.mxu1 %v4114_v1  ;;  %v3921_v25 = vunpack.i.h.bf16 %v3919_v29  ;;  %v3920_v28 = vunpack.i.l.bf16 %v3919_v29 }
 0x84f   : > { %v3954_v49 = vpop.permute.xlu0 %3953 }
 0x850   : > { %v2216_v33 = vpack.c.bf16 %v3921_v25, %v3920_v28  ;;  %v3956_v50 = vunpack.i.h.bf16 %v3954_v49  ;;  %v3955_v52 = vunpack.i.l.bf16 %v3954_v49 }
 0x851   : > { %v4878_v35 = vpop.permute.xlu1 %3923 }
 0x852   : > { %v2220_v61 = vpack.c.bf16 %v3956_v50, %v3955_v52  ;;  %v3926_v49 = vunpack.i.h.bf16 %v4878_v35  ;;  %v3925_v50 = vunpack.i.l.bf16 %v4878_v35  ;;  %v3911_v52 = vunpack.i.h.bf16 %v4869_v30 }
 0x855   : > { %3591 = vmatpush3.bf16.xpose.msra.mxu1 %v2464_v40  ;;  %v3934_v36 = vpop.permute.xlu1 %3933 }
 0x856   : > { %3616 = vmatprep.subr.bf16.mxu1 %v4114_v1  ;;  %v3936_v38 = vunpack.i.h.bf16 %v3934_v36  ;;  %v3935_v43 = vunpack.i.l.bf16 %v3934_v36 }
 0x858   : > { %v2219_v53 = vpack.c.bf16 %v3936_v38, %v3935_v43 }
 0x859   : > { %v3939_v42 = vpop.permute.xlu1 %3938 }
 0x85a   : > { %v3941_v44 = vunpack.i.h.bf16 %v3939_v42  ;;  %v3940_v47 = vunpack.i.l.bf16 %v3939_v42 }
 0x85c   : > { %3593 = vmatmul.mubr.msk.bf16.vlgmr.msra.gmra.mrb[48].mxu1 %vm909_vm2, %v1853_v45  ;;  %v2218_v48 = vpack.c.bf16 %v3941_v44, %v3940_v47  ;;  %v3881_v47 = vunpack.i.h.bf16 %v4862_v13 }
 0x85d   : > { %3632 = vmatprep.mubr.msk.bf16.mxu1 %vm4115_vm0, %v4114_v1  ;;  %3617 = vmatpush3.bf16.msra.mxu1 %v2214_v11  ;;  %v3949_v62 = vpop.permute.xlu1 %3948 }
 0x85e   : > { %3618 = vmatprep.subr.bf16.mxu1 %v4114_v1  ;;  %v3951_v63 = vunpack.i.h.bf16 %v3949_v62  ;;  %v3950_v18 = vunpack.i.l.bf16 %v3949_v62  ;;  %v3946_v62 = vunpack.i.h.bf16 %v4881_v39 }
 0x860   : > { %v2221_v0 = vpack.c.bf16 %v3951_v63, %v3950_v18  ;;  %v3945_v63 = vunpack.i.l.bf16 %v4881_v39 }
 0x861   : > { %3619 = vmatpush3.bf16.msra.mxu1 %v2215_v10 }
 0x862   : > { %3620 = vmatprep.subr.bf16.mxu1 %v4114_v1 }
 0x865   : > { %3621 = vmatpush3.bf16.msra.mxu1 %v2216_v33  ;;  %v3896_v33 = vunpack.i.h.bf16 %v4871_v15 }
 0x866   : > { %3622 = vmatprep.subr.bf16.mxu1 %v4114_v1 }
 0x869   : > { %3623 = vmatpush3.bf16.msra.mxu1 %v2217_v34  ;;  %v3895_v34 = vunpack.i.l.bf16 %v4871_v15 }
 0x86a   : > { %3624 = vmatprep.subr.bf16.mxu1 %v4114_v1 }
 0x86d   : > { %3625 = vmatpush3.bf16.msra.mxu1 %v2218_v48  ;;  %v2222_v48 = vpack.c.bf16 %v3896_v33, %v3895_v34 }
 0x86e   : > { %3626 = vmatprep.subr.bf16.mxu1 %v4114_v1 }
 0x871   : > { %3627 = vmatpush3.bf16.msra.mxu1 %v2219_v53  ;;  %v2224_v53 = vpack.c.bf16 %v3926_v49, %v3925_v50 }
 0x872   : > { %3628 = vmatprep.subr.bf16.mxu1 %v4114_v1 }
 0x875   : > { %3629 = vmatpush3.bf16.msra.mxu1 %v2220_v61 }
 0x876   : > { %3630 = vmatprep.subr.bf16.mxu1 %v4114_v1 }
 0x879   : > { %3631 = vmatpush3.bf16.msra.mxu1 %v2221_v0  ;;  %v2226_v0 = vpack.c.bf16 %v3946_v62, %v3945_v63 }
 0x87a   : > { %3656 = vmatprep.subr.bf16.mxu1 %v4114_v1 }
 0x87c   : > { %v2299_v46 = vpop.f32.mrb[36].mxu0 }
 0x87d   : > { %v2506_v59 = vmul.f32 0.35355338, %v2299_v46  ;;  %v3534_v37 = vpop.f32.mrb[37].mxu0 }
 0x87e   : > { %v2302_v60 = vpop.f32.mrb[38].mxu0 }
 0x87f   : > { %v3535_v57 = vpop.f32.mrb[39].mxu0  ;;  %v4858_v7 = vadd.f32 %v4855_v55, %v2506_v59 }
 0x881   : > { %2520 = vmax.xlane.f32.xlu0 %v4858_v7 }
 0x8ef   : > { %v2366_v4 = vpop.f32.mrb[44].mxu1  ;;  %v2433_v20 = vpop.f32.mrb[40].mxu0 }
 0x8f0   : > { %v2507_v21 = vmul.f32 0.35355338, %v2366_v4  ;;  %v2508_v26 = vmul.f32 0.35355338, %v2433_v20  ;;  %v3554_v27 = vpop.f32.mrb[45].mxu1  ;;  %v3574_v31 = vpop.f32.mrb[41].mxu0 }
 0x8f1   : > { %v2369_v32 = vpop.f32.mrb[46].mxu1  ;;  %v2436_v40 = vpop.f32.mrb[42].mxu0 }
 0x8f2   : > { %v3575_v41 = vpop.f32.mrb[43].mxu0  ;;  %v3555_v45 = vpop.f32.mrb[47].mxu1  ;;  %v2518_v46 = vadd.f32 %v4855_v55, %v2508_v26  ;;  %v2517_v59 = vadd.f32 %v4855_v55, %v2507_v21  ;;  %v3901_v40 = vunpack.i.h.bf16 %v4864_v51 }
 0x8f3   : > { %v3900_v41 = vunpack.i.l.bf16 %v4864_v51 }
 0x8f4   : > { %2524 = vmax.xlane.f32.xlu0 %v2518_v46  ;;  %2522 = vmax.xlane.f32.xlu1 %v2517_v59 }
 0x905   : > { %3958 = vrot.lane.b32.xlu1 %v4762_v54, %s5145_s30 }
 0x90e   : > { %v2521_v37 = vpop.xlane.xlu0 %2520 }
 0x90f   : > { %v2528_v60 = vsub.f32 %v4858_v7, %v2521_v37  ;;  %v2230_v37 = vpack.c.bf16 %v3901_v40, %v3900_v41 }
 0x911   : > { %v2532_v57 = vmul.f32 1.442695, %v2528_v60 }
 0x913   : > { %4030 = vpow2.f32 %v2532_v57  ;;  %v3931_v57 = vunpack.i.h.bf16 %v4876_v24 }
 0x91d   : > { %v4031_v56 = vpop.eup %4030 }
 0x929   : > { %2540 = vadd.xlane.f32.xlu1 %v4031_v56 }
 0x92f   : > { %v2500_v9 = vpop.f32.mrb[48].mxu1 }
 0x930   : > { %v2509_v2 = vmul.f32 0.35355338, %v2500_v9  ;;  %v3594_v12 = vpop.f32.mrb[49].mxu1 }
 0x931   : > { %v2503_v6 = vpop.f32.mrb[50].mxu1 }
 0x932   : > { %v3595_v8 = vpop.f32.mrb[51].mxu1  ;;  %v2519_v11 = vadd.f32 %v4855_v55, %v2509_v2  ;;  %v3915_v2 = vunpack.i.l.bf16 %v4873_v3 }
 0x934   : > { %2526 = vmax.xlane.f32.xlu0 %v2519_v11 }
 0x93a   : > { %3968 = vrot.lane.b32.xlu1 %v4798_v5, %s5145_s30 }
 0x93e   : > { %3978 = vrot.lane.b32.xlu1 %v4775_v17, %s5145_s30 }
 0x94a   : > { %3963 = vrot.lane.b32.xlu0 %v4798_v5, %s5146_s23 }
 0x981   : > { %v2525_v54 = vpop.xlane.xlu0 %2524  ;;  %v2523_v7 = vpop.xlane.xlu1 %2522 }
 0x982   : > { %v2530_v10 = vsub.f32 %v2518_v46, %v2525_v54  ;;  %v2529_v19 = vsub.f32 %v2517_v59, %v2523_v7  ;;  %v3886_v59 = vunpack.i.h.bf16 %v4867_v14 }
 0x984   : > { %v2536_v29 = vmul.f32 1.442695, %v2530_v10  ;;  %v2534_v22 = vmul.f32 1.442695, %v2529_v19 }
 0x985   : > { %v4906_v5 = vpop.permute.xlu1 %3958 }
 0x986   : > { %4032 = vpow2.f32 %v2536_v29  ;;  %v3961_v8 = vunpack.i.h.bf16 %v4906_v5 }
 0x987   : > { %4034 = vpow2.f32 %v2534_v22 }
 0x990   : > { %v4899_v23 = vpop.eup %4032 }
 0x991   : > { %v4035_v55 = vpop.eup %4034  ;;  %2544 = vadd.xlane.f32.xlu1 %v4899_v23 }
 0x992   : > { %2542 = vadd.xlane.f32.xlu0 %v4035_v55 }
 0x9a2   : > { %3988 = vrot.lane.b32.xlu1 %v4813_v16, %s5145_s30  ;;  %s4963_s30 = sshll.u32 %s679_s26, 3 }
 0x9a8   : > { %3973 = vrot.lane.b32.xlu0 %v4775_v17, %s5146_s23  ;;  %v3880_v17 = vunpack.i.l.bf16 %v4862_v13  ;;  %v3910_v13 = vunpack.i.l.bf16 %v4869_v30 }
 0x9aa   : > { %v2223_v15 = vpack.c.bf16 %v3881_v47, %v3880_v17  ;;  %v2225_v18 = vpack.c.bf16 %v3911_v52, %v3910_v13 }
 0x9b6   : > { %v2541_v25 = vpop.xlane.xlu1 %2540 }
 0x9b7   : > { %4036 = vrcp.f32 %v2541_v25 }
 0x9ba   : > { %v3969_v51 = vpop.permute.xlu1 %3968 }
 0x9bb   : > { %v3971_v7 = vunpack.i.h.bf16 %v3969_v51  ;;  %v3970_v10 = vunpack.i.l.bf16 %v3969_v51 }
 0x9be   : > { %v3979_v12 = vpop.permute.xlu1 %3978 }
 0x9bf   : > { %v3981_v19 = vunpack.i.h.bf16 %v3979_v12  ;;  %v3980_v29 = vunpack.i.l.bf16 %v3979_v12 }
 0x9c1   : > { %v4037_v28 = vpop.eup %4036  ;;  %v2527_v36 = vpop.xlane.xlu0 %2526 }
 0x9c2   : > { %v2531_v42 = vsub.f32 %v2519_v11, %v2527_v36  ;;  %v4910_v38 = vmul.f32 %v4037_v28, %v4031_v56  ;;  %v3930_v56 = vunpack.i.l.bf16 %v4876_v24  ;;  %v3960_v11 = vunpack.i.l.bf16 %v4906_v5 }
 0x9c4   : > { %v2538_v43 = vmul.f32 1.442695, %v2531_v42  ;;  %v2560_v44 = vpack.c.bf16 %v4910_v38, %v4910_v38  ;;  %v2232_v9 = vpack.c.bf16 %v3931_v57, %v3930_v56  ;;  %v2234_v54 = vpack.c.bf16 %v3961_v8, %v3960_v11  ;;  %v3241_v57 = vld [vmem:[%s5099_s12 + $0x3] ss:$0 sm:$0xff] }
 0x9c5   : > { %v3964_v35 = vpop.permute.xlu0 %3963 }
 0x9c6   : > { %4038 = vpow2.f32 %v2538_v43  ;;  %3613 = vmatmul.mubr.bf16.vlgmr.msra.gmra.mrb[44].mxu0 %v2560_v44  ;;  %v3966_v4 = vunpack.i.h.bf16 %v3964_v35  ;;  %v3965_v30 = vunpack.i.l.bf16 %v3964_v35 }
 0x9c7   : > { %3637 = vmatpush3.bf16.msra.mxu0 %v2222_v48  ;;  %3652 = vmatprep.mubr.msk.bf16.mxu0 %vm4115_vm0, %v4114_v1 }
 0x9c8   : > { %3638 = vmatprep.subr.bf16.mxu0 %v4114_v1  ;;  %v2227_v20 = vpack.c.bf16 %v3966_v4, %v3965_v30  ;;  %v4004_v4 = vld [vmem:[%s5098_s11 + $0x30] sm:$0xff]   ;;  %v4005_v30 = vld [vmem:[%s5098_s11 + $0x38] sm:$0xff]  }
 0x9cb   : > { %3639 = vmatpush3.bf16.msra.mxu0 %v2223_v15 }
 0x9cc   : > { %3640 = vmatprep.subr.bf16.mxu0 %v4114_v1 }
 0x9cf   : > { %3641 = vmatpush3.bf16.msra.mxu0 %v2224_v53 }
 0x9d0   : > { %v4924_v61 = vpop.eup %4038  ;;  %3642 = vmatprep.subr.bf16.mxu0 %v4114_v1 }
 0x9d1   : > { %2546 = vadd.xlane.f32.xlu0 %v4924_v61 }
 0x9d3   : > { %3643 = vmatpush3.bf16.msra.mxu0 %v2225_v18 }
 0x9d4   : > { %3644 = vmatprep.subr.bf16.mxu0 %v4114_v1 }
 0x9d7   : > { %3645 = vmatpush3.bf16.msra.mxu0 %v2226_v0 }
 0x9d8   : > { %3646 = vmatprep.subr.bf16.mxu0 %v4114_v1 }
 0x9db   : > { %3647 = vmatpush3.bf16.msra.mxu0 %v2227_v20 }
 0x9dc   : > { %3648 = vmatprep.subr.bf16.mxu0 %v4114_v1 }
 0x9e7   : > { %3983 = vrot.lane.b32.xlu0 %v4813_v16, %s5146_s23  ;;  %v3885_v16 = vunpack.i.l.bf16 %v4867_v14  ;;  %v3916_v14 = vunpack.i.h.bf16 %v4873_v3  ;;  %v2235_v3 = vpack.c.bf16 %v3971_v7, %v3970_v10  ;;  %s681_s23 = scalar_lea.vmem [#allocation2], %s4963_s30  ;;  %v4006_v10 = vld [vmem:[%s5100_s13] sm:$0xff]  }
 0x9e8   : > { %s3036_s6 = sshll.u32 %s681_s23, 4  ;;  %s3037_s6 = int_to_ptr.vmem [resolvable:$true] %s3036_s6 }
 0x9e9   : > { %v2231_v60 = vpack.c.bf16 %v3886_v59, %v3885_v16  ;;  %v2233_v6 = vpack.c.bf16 %v3916_v14, %v3915_v2  ;;  %s4050_s28 = scalar_lea.vmem %s3037_s6, 128 }
 0x9ea   : > { %p4051_p11 = scmp.ne.s32.totalorder %s3037_s6, %s4050_s28 }
 0x9ec   : > { %p4052_p12 = pnand %p4051_p11, %p4267_p5 }
 0x9ee   : > { %p4053_p13 = pneg %p4052_p12 }
 0xa1e   : > { %v2545_v24 = vpop.xlane.xlu1 %2544 }
 0xa1f   : > { %v2543_v39 = vpop.xlane.xlu0 %2542 }
 0xa20   : > { %4040 = vrcp.f32 %v2543_v39 }
 0xa21   : > { %4042 = vrcp.f32 %v2545_v24 }
 0xa22   : > { %v3989_v22 = vpop.permute.xlu1 %3988 }
 0xa23   : > { %v3974_v21 = vpop.permute.xlu0 %3973  ;;  %v3991_v25 = vunpack.i.h.bf16 %v3989_v22  ;;  %v3990_v5 = vunpack.i.l.bf16 %v3989_v22 }
 0xa24   : > { %v3976_v26 = vunpack.i.h.bf16 %v3974_v21  ;;  %v3975_v27 = vunpack.i.l.bf16 %v3974_v21 }
 0xa25   : > { %v2237_v28 = vpack.c.bf16 %v3991_v25, %v3990_v5  ;;  %v3245_v5 = vld [vmem:[%s5104_s17 + $0x1] ss:$0 sm:$0xff] }
 0xa26   : > { %v2228_v31 = vpack.c.bf16 %v3976_v26, %v3975_v27 }
 0xa28   : > { %3649 = vmatpush3.bf16.msra.mxu0 %v2228_v31 }
 0xa29   : > { %3650 = vmatprep.subr.bf16.mxu0 %v4114_v1 }
 0xa2a   : > { %v4041_v32 = vpop.eup %4040 }
 0xa2b   : > { %v2557_v45 = vmul.f32 %v4041_v32, %v4035_v55  ;;  %v2236_v55 = vpack.c.bf16 %v3981_v19, %v3980_v29  ;;  %v4043_v34 = vpop.eup %4042  ;;  %v4009_v19 = vld [vmem:[%s5102_s15 + $0x8] sm:$0xff]  }
 0xa2c   : > { %v2558_v44 = vmul.f32 %v4043_v34, %v4899_v23 }
 0xa2d   : > { %v2561_v46 = vpack.c.bf16 %v2557_v45, %v2557_v45  ;;  %v2724_v17 = vadd.f32 %v2557_v45, %v4910_v38 }
 0xa2e   : > { %v2562_v48 = vpack.c.bf16 %v2558_v44, %v2558_v44 }
 0xa2f   : > { %3633 = vmatmul.mubr.bf16.vlgmr.msra.gmra.mrb[52].mxu1 %v2561_v46  ;;  %v2725_v50 = vadd.f32 %v2724_v17, %v2558_v44  ;;  %v4011_v44 = vld [vmem:[%s5102_s15 + $0x18] sm:$0xff]  }
 0xa30   : > { %3657 = vmatpush3.bf16.msra.mxu1 %v2230_v37  ;;  %3672 = vmatprep.mubr.msk.bf16.mxu1 %vm4115_vm0, %v4114_v1 }
 0xa31   : > { %3658 = vmatprep.subr.bf16.mxu1 %v4114_v1 }
 0xa34   : > { %3659 = vmatpush3.bf16.msra.mxu1 %v2231_v60 }
 0xa35   : > { %3660 = vmatprep.subr.bf16.mxu1 %v4114_v1 }
 0xa38   : > { %3661 = vmatpush3.bf16.msra.mxu1 %v2232_v9 }
 0xa39   : > { %3662 = vmatprep.subr.bf16.mxu1 %v4114_v1 }
 0xa3c   : > { %3663 = vmatpush3.bf16.msra.mxu1 %v2233_v6 }
 0xa3d   : > { %3664 = vmatprep.subr.bf16.mxu1 %v4114_v1 }
 0xa40   : > { %3665 = vmatpush3.bf16.msra.mxu1 %v2234_v54 }
 0xa41   : > { %3666 = vmatprep.subr.bf16.mxu1 %v4114_v1 }
 0xa44   : > { %3667 = vmatpush3.bf16.msra.mxu1 %v2235_v3  ;;  %v4007_v3 = vld [vmem:[%s5100_s13 + $0x8] sm:$0xff]  }
 0xa45   : > { %3668 = vmatprep.subr.bf16.mxu1 %v4114_v1 }
 0xa48   : > { %3669 = vmatpush3.bf16.msra.mxu1 %v2236_v55 }
 0xa49   : > { %3670 = vmatprep.subr.bf16.mxu1 %v4114_v1 }
 0xa4c   : > { %3671 = vmatpush3.bf16.msra.mxu1 %v2237_v28 }
 0xa4d   : > { %3684 = vmatprep.subr.bf16.mxu1 %v4114_v1 }
 0xa5e   : > { %v2547_v33 = vpop.xlane.xlu0 %2546 }
 0xa5f   : > { %4044 = vrcp.f32 %v2547_v33  ;;  %v3246_v33 = vld [vmem:[%s5105_s18 + $0x1] ss:$0 sm:$0xff] }
 0xa62   : > { %v3984_v36 = vpop.permute.xlu0 %3983 }
 0xa63   : > { %v3986_v42 = vunpack.i.h.bf16 %v3984_v36  ;;  %v3985_v43 = vunpack.i.l.bf16 %v3984_v36 }
 0xa65   : > { %v2229_v47 = vpack.c.bf16 %v3986_v42, %v3985_v43  ;;  %v4010_v43 = vld [vmem:[%s5102_s15 + $0x10] sm:$0xff]  }
 0xa67   : > { %3651 = vmatpush3.bf16.msra.mxu0 %v2229_v47  ;;  %v3247_v47 = vld [vmem:[%s5101_s14] ss:$0 sm:$0xff] }
 0xa68   : > { %3676 = vmatprep.subr.bf16.mxu0 %v4114_v1 }
 0xa69   : > { %v4045_v15 = vpop.eup %4044 }
 0xa6a   : > { %3653 = vmatmul.mubr.bf16.vlgmr.msra.gmra.mrb[48].mxu0 %v2562_v48  ;;  %v2559_v49 = vmul.f32 %v4045_v15, %v4924_v61 }
 0xa6b   : > { %3680 = vmatprep.mubr.msk.bf16.mxu0 %vm4115_vm0, %v4114_v1  ;;  %3677 = vmatpush3.bf16.msra.mxu0 %v4004_v4 }
 0xa6c   : > { %v2563_v23 = vpack.c.bf16 %v2559_v49, %v2559_v49  ;;  %v2726_v38 = vadd.f32 %v2725_v50, %v2559_v49  ;;  %3678 = vmatprep.subr.bf16.mxu0 %v4114_v1 }
 0xa6e   : > { %3673 = vmatmul.mubr.bf16.vlgmr.msra.gmra.mrb[56].mxu1 %v2563_v23  ;;  %v2727_v52 = vmul.f32 0.25, %v2726_v38 }
 0xa6f   : > { %3688 = vmatprep.mubr.msk.bf16.mxu1 %vm4115_vm0, %v4114_v1  ;;  %3679 = vmatpush3.bf16.msra.mxu0 %v4005_v30 }
 0xa70   : > { %3014 = vst [vmem:[%s681_s23] sm:$0xff] %v2727_v52  ;;  %3692 = vmatprep.subr.bf16.mxu0 %v4114_v1  ;;  %3685 = vmatpush3.bf16.msra.mxu1 %v4006_v10 }
 0xa71   : > { %3686 = vmatprep.subr.bf16.mxu1 %v4114_v1 }
 0xa74   : > { %3687 = vmatpush3.bf16.msra.mxu1 %v4007_v3 }
 0xa99   : > { %v2598_v13 = vpop.f32.mrb[44].mxu0 }
 0xa9a   : > { %v3614_v53 = vpop.f32.mrb[45].mxu0 }
 0xa9b   : > { %v2601_v61 = vpop.f32.mrb[46].mxu0 }
 0xa9c   : > { %v3615_v62 = vpop.f32.mrb[47].mxu0 }
 0xb02   : > { %v2638_v63 = vpop.f32.mrb[52].mxu1 }
 0xb03   : > { %2729 = vrot.lane.b32.xlu0 %v2638_v63, %s5148_s21  ;;  %v3634_v18 = vpop.f32.mrb[53].mxu1  ;;  %s4123_s21 = smov [#allocation2]  }
 0xb04   : > { %v2641_v35 = vpop.f32.mrb[54].mxu1  ;;  %s4054_s25 = sshll.u32 %s4123_s21, 4  ;;  %s4055_s25 = int_to_ptr.vmem [resolvable:$false] %s4054_s25 }
 0xb05   : > { %v3635_v0 = vpop.f32.mrb[55].mxu1  ;;  %s4056_s9 = scalar_lea.vmem %s4055_s25, 256  ;;  %p4057_p0 = scmp.lt.s32.totalorder %s3037_s6, %s4055_s25 }
 0xb06   : > { %p4058_p1 = scmp.lt.s32.totalorder %s4056_s9, %s4050_s28 }
 0xb08   : > { %p4059_p2 = por %p4058_p1, %p4057_p0 }
 0xb0a   : > { %p4060_p3 = pnand %p4059_p2, %p4053_p13 }
 0xb3d   : > { %v2678_v20 = vpop.f32.mrb[48].mxu0 }
 0xb3e   : > { %2733 = vrot.lane.b32.xlu1 %v2678_v20, %s5149_s5  ;;  %v3654_v39 = vpop.f32.mrb[49].mxu0 }
 0xb3f   : > { %v2681_v21 = vpop.f32.mrb[50].mxu0 }
 0xb40   : > { %v3655_v26 = vpop.f32.mrb[51].mxu0 }
 0xb41   : > { %v2718_v27 = vpop.f32.mrb[56].mxu1 }
 0xb42   : > { %2737 = vrot.lane.b32.xlu0 %v2718_v27, %s5150_s8  ;;  %v3674_v31 = vpop.f32.mrb[57].mxu1  ;;  %s5038_s8 = scalar_lea.hbm %s5107_s20, %s3260_s0 }
 0xb43   : > { %v2721_v32 = vpop.f32.mrb[58].mxu1 }
 0xb44   : > { %v3675_v40 = vpop.f32.mrb[59].mxu1 }
 0xb75   : > { %v2730_v41 = vpop.permute.xlu0 %2729 }
 0xb76   : > { %v2740_v46 = vsel %vm909_vm2, %v2598_v13, %v2730_v41 }
 0xbb0   : > { %v2734_v45 = vpop.permute.xlu1 %2733 }
 0xbb1   : > { %v2741_v59 = vsel %vm1357_vm4, %v2740_v46, %v2734_v45 }
 0xbb4   : > { %v2738_v16 = vpop.permute.xlu0 %2737 }
 0xbb5   : > { %v2742_v37 = vsel %vm1359_vm5, %v2741_v59, %v2738_v16 }
 0xbb6   : > { %v2743_v60 = vpack.c.bf16 %v2742_v37, %v2742_v37 }
 0xbb8   : > { %3681 = vmatmul.mubr.msk.bf16.vlgmr.msra.gmra.mrb[52].mxu0 %vm767_vm1, %v2743_v60 }
 0xbb9   : > { %3700 = vmatprep.mubr.msk.bf16.mxu0 %vm4115_vm0, %v4114_v1 }
 0xc8b   : > { %v2803_v56 = vpop.f32.mrb[52].mxu0 }
 0xc8c   : > { %v2804_v51 = vadd.f32 %v3241_v57, %v2803_v56  ;;  %v3682_v9 = vpop.f32.mrb[53].mxu0 }
 0xc8d   : > { %v2806_v14 = vpop.f32.mrb[54].mxu0 }
 0xc8e   : > { %v3683_v2 = vpop.f32.mrb[55].mxu0  ;;  %v2809_v12 = vadd.f32 %v2804_v51, %v4608_v58  ;;  %v4008_v58 = vld [vmem:[%s5102_s15] sm:$0xff]  }
 0xc8f   : > { %3693 = vmatpush3.bf16.msra.mxu0 %v4008_v58 }
 0xc90   : > { %v2812_v6 = vsel %vm767_vm1, %v2809_v12, 0.0  ;;  %3694 = vmatprep.subr.bf16.mxu0 %v4114_v1 }
 0xc91   : > { %2813 = vadd.xlane.f32.xlu1 %v2812_v6 }
 0xc93   : > { %3695 = vmatpush3.bf16.msra.mxu0 %v4009_v19 }
 0xc94   : > { %3696 = vmatprep.subr.bf16.mxu0 %v4114_v1 }
 0xc97   : > { %3697 = vmatpush3.bf16.msra.mxu0 %v4010_v43 }
 0xc98   : > { %3698 = vmatprep.subr.bf16.mxu0 %v4114_v1  ;;  %v3251_v1 = vld [vmem:[%s5103_s16] ss:$0 sm:$0xff] }
 0xc9b   : > { %3699 = vmatpush3.bf16.msra.mxu0 %v4011_v44 }
 0xd1e   : > { %v2814_v8 = vpop.xlane.xlu1 %2813 }
 0xd1f   : > { %v2815_v11 = vmul.f32 0.03125, %v2814_v8 }
 0xd21   : > { %v2816_v24 = vsub.f32 %v2809_v12, %v2815_v11 }
 0xd23   : > { %v2817_v54 = vmul.f32 %v2816_v24, %v2816_v24 }
 0xd25   : > { %v2818_v7 = vsel %vm767_vm1, %v2817_v54, 0.0 }
 0xd26   : > { %2819 = vadd.xlane.f32.xlu0 %v2818_v7 }
 0xdb3   : > { %v2820_v29 = vpop.xlane.xlu0 %2819 }
 0xdb4   : > { %v2821_v22 = vmul.f32 0.03125, %v2820_v29 }
 0xdb6   : > { %v2822_v55 = vadd.f32 1e-05, %v2821_v22 }
 0xdb8   : > { %4046 = vrsqrt.f32 %v2822_v55 }
 0xdc2   : > { %v4047_v25 = vpop.eup %4046 }
 0xdc3   : > { %v2824_v28 = vmul.f32 %v4047_v25, %v2816_v24 }
 0xdc5   : > { %v2829_v34 = vmul.f32 %v3245_v5, %v2824_v28 }
 0xdc7   : > { %v2834_v36 = vadd.f32 %v3246_v33, %v2829_v34 }
 0xdc9   : > { %v2835_v42 = vpack.c.bf16 %v2834_v36, %v2834_v36 }
 0xdcb   : > { %3689 = vmatmul.mubr.msk.bf16.vlgmr.msra.gmra.mrb[60].mxu1 %vm767_vm1, %v2835_v42 }
 0xe9e   : > { %v2896_v17 = vpop.f32.mrb[60].mxu1 }
 0xe9f   : > { %v2897_v48 = vadd.f32 %v3247_v47, %v2896_v17  ;;  %v3690_v15 = vpop.f32.mrb[61].mxu1 }
 0xea0   : > { %v2899_v49 = vpop.f32.mrb[62].mxu1 }
 0xea1   : > { %v2902_v50 = vmax.f32 %v2897_v48, 0.0  ;;  %v3691_v23 = vpop.f32.mrb[63].mxu1 }
 0xea3   : > { %v2903_v38 = vpack.c.bf16 %v2902_v50, %v2902_v50 }
 0xea5   : > { %3701 = vmatmul.mubr.msk.bf16.vlgmr.msra.gmra.mrb[56].mxu0 %vm2943_vm6, %v2903_v38 }
 0xf78   : > { %v2981_v52 = vpop.f32.mrb[56].mxu0 }
 0xf79   : > { %v2982_v13 = vadd.f32 %v3251_v1, %v2981_v52  ;;  %v3702_v53 = vpop.f32.mrb[57].mxu0 }
 0xf7a   : > { %v2984_v61 = vpop.f32.mrb[58].mxu0 }
 0xf7b   : > { %v3703_v62 = vpop.f32.mrb[59].mxu0  ;;  %v2987_v63 = vadd.f32 %v2982_v13, %v2834_v36 }
 0xf7d   : > { %v2990_v18 = vsel %vm767_vm1, %v2987_v63, 0.0 }
 0xf7e   : > { %2991 = vadd.xlane.f32.xlu0 %v2990_v18 }
0x100b   : > { %v2992_v35 = vpop.xlane.xlu0 %2991 }
0x100c   : > { %v2993_v0 = vmul.f32 0.03125, %v2992_v35 }
0x100e   : > { %v2994_v4 = vsub.f32 %v2987_v63, %v2993_v0 }
0x1010   : > { %v2995_v30 = vmul.f32 %v2994_v4, %v2994_v4 }
0x1012   : > { %v2996_v20 = vsel %vm767_vm1, %v2995_v30, 0.0 }
0x1013   : > { %2997 = vadd.xlane.f32.xlu1 %v2996_v20 }
0x1014   : > { %4063 = shalt.err (!%p4060_p3)
}
0x1015   : > { %s4064_s2 = scalar_lea.hbm %s5038_s8, 128  ;;  %s4068_s23 = scalar_lea.hbm %s5107_s20, 256 }
0x1016   : > { %p4065_p4 = scmp.ne.s32.totalorder %s5038_s8, %s4064_s2  ;;  %p4069_p9 = scmp.lt.u32.totalorder %s5038_s8, %s5107_s20 }
0x1017   : > { %p4070_p10 = scmp.lt.u32.totalorder %s4068_s23, %s4064_s2  ;;  %p4072_p12 = scmp.lt.u32.totalorder %s4064_s2, %s5038_s8 }
0x1018   : > { %p4066_p7 = pnand %p4065_p4, %p4267_p5 }
0x1019   : > { %p4071_p11 = por %p4070_p10, %p4069_p9 }
0x101a   : > { %p4067_p8 = pneg %p4066_p7 }
0x101b   : > { %p4073_p13 = por %p4072_p12, %p4071_p11 }
0x101d   : > { %p4074_p0 = pnand %p4073_p13, %p4067_p8 }
0x101f   : > { %4077 = shalt.err (!%p4074_p0)
}
0x1020   : > { %3704 = dma.vmem_to_hbm [thread:$0]  (%p4267_p5), %s3037_s6, 128, %s5038_s8, %s3020_s3   ;;  %v3257_v31 = vld [vmem:[%s5104_s17 + $0x2] ss:$0 sm:$0xff] }
0x1021   : > { %v3258_v40 = vld [vmem:[%s5105_s18 + $0x2] ss:$0 sm:$0xff]  ;;  %s706_s2 = scalar_lea.vmem %s5106_s19, %s4295_s27 }
0x10a0   : > { %v2998_v39 = vpop.xlane.xlu1 %2997 }
0x10a1   : > { %v2999_v21 = vmul.f32 0.03125, %v2998_v39 }
0x10a3   : > { %v3000_v26 = vadd.f32 1e-05, %v2999_v21 }
0x10a5   : > { %4048 = vrsqrt.f32 %v3000_v26 }
0x10af   : > { %v4049_v27 = vpop.eup %4048 }
0x10b0   : > { %v3002_v32 = vmul.f32 %v4049_v27, %v2994_v4 }
0x10b2   : > { %v3007_v41 = vmul.f32 %v3257_v31, %v3002_v32 }
0x10b4   : > { %v3012_v45 = vadd.f32 %v3258_v40, %v3007_v41 }
0x10b6   : > { %3013 = vst.msk [vmem:[%s706_s2] sm:$0xff] %vm767_vm1, %v3012_v45 }
0x10b7 PF: > { %p3710_p5 = scmp.ge.s32.totalorder %s4112_s24, 2  ;;  %s3055_s6 = sand.u32 1, %s4100_s1  }
0x10b8   : > { %s3056_s8 = scalar_lea.sflag [#allocation3], %s3055_s6 }
0x10b9   : > { %p3707_p1 = pnand %p3710_p5, %p4271_p6 }
0x10bb   : > { %4095 = dma.done.wait (!%p3707_p1), %s3056_s8, 128  }
0x10bc   : > { %4097 = vsyncadd (!%p3707_p1), %s3056_s8, 4294967168  ;;  %s5151_s24 = sld [smem:[#allocation6_spill]]  ;;  %s5152_s3 = sld [smem:[#allocation5_spill]] }
0x10bd   : > { %s5153_s23 = sld [smem:[#allocation7_spill]]  ;;  %s5154_s1 = smov %s4104_s22 }
0x10c2   : > { %p31_p2 = scmp.ge.s32.totalorder %s5151_s24, 4   ;;  %s5155_s22 = smov %s5152_s3 }
0x10c4   :  { %33 = sbr.rel (!%p31_p2) target bundleno = 14 (0xe), region = 158 }
0x10cb   :  { %3061 = vsyncpa [#allocation3], 1 }
0x10cc   :  { %3063 = vsyncpa [#allocation3 + $0x1], 1 }

</bundles_post_ra>
